<compile_context>
chip_gen: v7x
topology: tpu7x:2x2x1
jax: 0.10.0
libtpu: 0.0.40
codegen_flags: <defaults>
</compile_context>

<pallas_src>
import functools

import jax
import jax.numpy as jnp
from jax.experimental import pallas as pl
from jax.experimental.pallas import tpu as pltpu


def _round_up(x, m):
    return ((x + m - 1) // m) * m


def _cdiv(a, b):
    return -(-a // b)


def _tensorcores_per_chip():
    """2 TensorCores per chip on v7x, 1 on v5e/v6e; safe fallback is 1."""
    try:
        kind = jax.devices()[0].device_kind.lower()
    except Exception:
        return 1
    return 2 if ("v7" in kind or "7x" in kind) else 1


def _attention_block_kernel(x_ref, wqk_ref, bqk_ref, wn_ref, bn_ref,
                            wo_ref, bo_ref, o_ref):
    x = x_ref[...]                                               # (tb, Dp) f32
    Dp = x.shape[1]

    # Fused Q/K projection: one 2*Dp-wide MXU matmul instead of two Dp-wide.
    qk = jnp.dot(x, wqk_ref[...], preferred_element_type=jnp.float32) + bqk_ref[...]
    qk = jnp.maximum(qk, 0.0)                                    # relu(Q)||relu(K)
    s = qk[:, :Dp] + qk[:, Dp:]                                  # Q + K (lane-aligned split)

    # sigmoid = 1 / (1 + exp(-s)); exp and approx reciprocal both run on EUP.
    gate1 = pl.reciprocal(1.0 + jnp.exp(-s), approx=True)
    out = gate1 * x                                              # attention_weights * V

    n = jnp.dot(out, wn_ref[...], preferred_element_type=jnp.float32) + bn_ref[...]
    gate2 = pl.reciprocal(1.0 + jnp.exp(-jnp.maximum(n, 0.0)), approx=True)
    f2 = x + gate2 * out                                         # residual

    y = jnp.dot(f2, wo_ref[...], preferred_element_type=jnp.float32) + bo_ref[...]
    o_ref[...] = y.astype(o_ref.dtype)


def prepare_params(wq, bq, wk, bk, wn, bn, wo, bo):
    """One-time parameter prep: cast to f32, zero-pad to lane-dense (…,128)
    multiples, and fuse query||key into a single (Dp, 2*Dp) weight.

    Zero padding is exact: padded x columns are 0 and padded weight rows/cols
    and bias entries are 0, so although the sigmoid of a padded logit is 0.5,
    it always multiplies a zero V column — every padded column of out/F2/y
    stays exactly 0.
    """
    D = wq.shape[0]
    d_out = wo.shape[1]
    Dp = _round_up(max(D, 128), 128)
    Op = _round_up(max(d_out, 128), 128)
    f32 = jnp.float32

    def pad2(a, rows, cols):
        return jnp.pad(a.astype(f32),
                       ((0, rows - a.shape[0]), (0, cols - a.shape[1])))

    wqk = jnp.concatenate([pad2(wq, Dp, Dp), pad2(wk, Dp, Dp)], axis=1)
    bqk = jnp.concatenate([pad2(bq.reshape(1, -1), 1, Dp),
                           pad2(bk.reshape(1, -1), 1, Dp)], axis=1)

    params = dict(
        wqk=wqk, bqk=bqk,                                       # (Dp, 2Dp), (1, 2Dp)
        wn=pad2(wn, Dp, Dp), bn=pad2(bn.reshape(1, -1), 1, Dp),
        wo=pad2(wo, Dp, Op), bo=pad2(bo.reshape(1, -1), 1, Op),
    )
    meta = dict(D=D, d_out=d_out, Dp=Dp, Op=Op)
    return params, meta


@functools.partial(jax.jit, static_argnames=("d_out", "num_cores", "max_block_b"))
def attention_block_forward(x, params, *, d_out, num_cores=1, max_block_b=512):
    """x: (B, D) f32; params: output of prepare_params (padded, fused)."""
    B, D = x.shape
    Dp = params["wn"].shape[0]
    Op = params["wo"].shape[1]

    # Grid: one batch tile per TensorCore (v7x: 2 equal "parallel" tiles; the
    # single-TC chips collapse to one step, avoiding ~0.35 us/step overhead),
    # with a cap on rows per tile so large batches keep a bounded VMEM tile.
    steps = max(num_cores, _cdiv(B, max_block_b))
    steps = _round_up(steps, num_cores)
    tb = _round_up(_cdiv(B, steps), 8)
    Bp = tb * steps

    xp = jnp.pad(x.astype(jnp.float32), ((0, Bp - B), (0, Dp - D)))

    # Constant index_map -> weights/biases stay resident in VMEM across steps.
    resident = lambda shape: pl.BlockSpec(shape, lambda i: (0, 0))

    cost = pl.CostEstimate(
        flops=2 * Bp * Dp * (3 * Dp + Op) + 12 * Bp * Dp,
        transcendentals=3 * Bp * Dp,          # two exps + two approx reciprocals
        bytes_accessed=4 * (Bp * Dp + 3 * Dp * Dp + Dp * Op
                            + 3 * Dp + Op + Bp * Op),
    )

    out_padded = pl.pallas_call(
        _attention_block_kernel,
        out_shape=jax.ShapeDtypeStruct((Bp, Op), jnp.float32),
        grid=(steps,),
        in_specs=[
            pl.BlockSpec((tb, Dp), lambda i: (i, 0)),        # x tile walks the batch
            resident((Dp, 2 * Dp)), resident((1, 2 * Dp)),   # fused query||key W, b
            resident((Dp, Dp)), resident((1, Dp)),           # nnout W, b
            resident((Dp, Op)), resident((1, Op)),           # output_linear W, b
        ],
        out_specs=pl.BlockSpec((tb, Op), lambda i: (i, 0)),
        compiler_params=pltpu.CompilerParams(
            dimension_semantics=("parallel",),
            vmem_limit_bytes=32 * 1024 * 1024),
        cost_estimate=cost,
    )(xp, params["wqk"], params["bqk"], params["wn"], params["bn"],
      params["wo"], params["bo"])

    return out_padded[:B, :d_out]


def reference_forward(x, wq, bq, wk, bk, wn, bn, wo, bo):
    q = jnp.maximum(x @ wq + bq, 0.0)
    k = jnp.maximum(x @ wk + bk, 0.0)
    out = jax.nn.sigmoid(q + k) * x
    aw2 = jax.nn.sigmoid(jnp.maximum(out @ wn + bn, 0.0))
    f2 = x + aw2 * out
    return f2 @ wo + bo


if __name__ == "__main__":
    # Shapes implied by the source model: input_output_dim = 64 hidden features,
    # output_linear maps back to the VDP state dimension (input_dim = 2).
    batch = 256
    input_output_dim = 64
    input_dim = 2

    key = jax.random.PRNGKey(0)
    kx, k1, k2, k3, k4, k5, k6, k7, k8 = jax.random.split(key, 9)

    x = jax.random.normal(kx, (batch, input_output_dim), dtype=jnp.float32)

    # PyTorch nn.Linear-style init: U(-1/sqrt(fan_in), 1/sqrt(fan_in)); weights
    # stored pre-transposed as (in_features, out_features).
    lim = 1.0 / (input_output_dim ** 0.5)
    u = lambda k, shape: jax.random.uniform(k, shape, jnp.float32, -lim, lim)
    wq = u(k1, (input_output_dim, input_output_dim)); bq = u(k2, (input_output_dim,))
    wk = u(k3, (input_output_dim, input_output_dim)); bk = u(k4, (input_output_dim,))
    wn = u(k5, (input_output_dim, input_output_dim)); bn = u(k6, (input_output_dim,))
    wo = u(k7, (input_output_dim, input_dim));        bo = u(k8, (input_dim,))

    # One-time padding / Q||K fusion (amortized across every forward call).
    params, meta = prepare_params(wq, bq, wk, bk, wn, bn, wo, bo)
    params = jax.block_until_ready(params)

    ncores = _tensorcores_per_chip()
    y = attention_block_forward(x, params, d_out=meta["d_out"], num_cores=ncores)
    y = jax.block_until_ready(y)

    y_ref = reference_forward(x, wq, bq, wk, bk, wn, bn, wo, bo)
    assert y.shape == (batch, input_dim)
    # Tolerance loosened slightly vs pure-f32: the approx (EUP) reciprocal in
    # the sigmoid introduces ~1e-4-level relative error.
    assert jnp.allclose(y, y_ref, atol=1e-2, rtol=1e-2), "mismatch vs reference"

    print("KERNEL_OK")
</pallas_src>

<mosaic_0001>
module attributes {stable_mosaic.version = 11 : i64} {
  func.func @_attention_block_kernel(%arg0: i32, %arg1: memref<256x128xf32, #tpu.memory_space<vmem>>, %arg2: memref<128x256xf32, #tpu.memory_space<vmem>>, %arg3: memref<1x256xf32, #tpu.memory_space<vmem>>, %arg4: memref<128x128xf32, #tpu.memory_space<vmem>>, %arg5: memref<1x128xf32, #tpu.memory_space<vmem>>, %arg6: memref<128x128xf32, #tpu.memory_space<vmem>>, %arg7: memref<1x128xf32, #tpu.memory_space<vmem>>, %arg8: memref<256x128xf32, #tpu.memory_space<vmem>>) attributes {dimension_semantics = [#tpu.dimension_semantics<parallel>], iteration_bounds = array<i64: 1>, scalar_prefetch = 0 : i64, scratch_operands = 0 : i64, tpu.core_type = #tpu.core_type<tc>, window_params = [{transform_indices = @transform_0, window_bounds = array<i64: 256, 128>}, {pipeline_mode = #tpu.pipeline_mode<synchronous>, transform_indices = @transform_1, window_bounds = array<i64: 128, 256>}, {pipeline_mode = #tpu.pipeline_mode<synchronous>, transform_indices = @transform_2, window_bounds = array<i64: 1, 256>}, {pipeline_mode = #tpu.pipeline_mode<synchronous>, transform_indices = @transform_3, window_bounds = array<i64: 128, 128>}, {pipeline_mode = #tpu.pipeline_mode<synchronous>, transform_indices = @transform_4, window_bounds = array<i64: 1, 128>}, {pipeline_mode = #tpu.pipeline_mode<synchronous>, transform_indices = @transform_5, window_bounds = array<i64: 128, 128>}, {pipeline_mode = #tpu.pipeline_mode<synchronous>, transform_indices = @transform_6, window_bounds = array<i64: 1, 128>}, {transform_indices = @transform_7, window_bounds = array<i64: 256, 128>}]} {
    %c0 = arith.constant 0 : index
    %c0_0 = arith.constant 0 : index
    %0 = vector.load %arg1[%c0, %c0_0] : memref<256x128xf32, #tpu.memory_space<vmem>>, vector<256x128xf32>
    %c0_1 = arith.constant 0 : index
    %c0_2 = arith.constant 0 : index
    %1 = vector.load %arg2[%c0_1, %c0_2] : memref<128x256xf32, #tpu.memory_space<vmem>>, vector<128x256xf32>
    %cst = arith.constant dense<0.000000e+00> : vector<256x256xf32>
    %2 = tpu.matmul %0, %1, %cst {dimension_numbers = #tpu.dot_dimension_numbers<[1], [0], [0], [1], [0, 0, 1, 1], [], []>} : vector<256x128xf32>, vector<128x256xf32>, vector<256x256xf32> -> vector<256x256xf32>
    %c0_3 = arith.constant 0 : index
    %c0_4 = arith.constant 0 : index
    %3 = vector.load %arg3[%c0_3, %c0_4] : memref<1x256xf32, #tpu.memory_space<vmem>>, vector<1x256xf32>
    %4 = vector.broadcast %3 : vector<1x256xf32> to vector<256x256xf32>
    %5 = arith.addf %2, %4 : vector<256x256xf32>
    %cst_5 = arith.constant 0.000000e+00 : f32
    %6 = vector.broadcast %cst_5 : f32 to vector<256x256xf32>
    %7 = arith.maximumf %5, %6 : vector<256x256xf32>
    %8 = vector.extract_strided_slice %7 {offsets = [0, 0], sizes = [256, 128], strides = [1, 1]} : vector<256x256xf32> to vector<256x128xf32>
    %9 = vector.extract_strided_slice %7 {offsets = [0, 128], sizes = [256, 128], strides = [1, 1]} : vector<256x256xf32> to vector<256x128xf32>
    %10 = arith.addf %8, %9 : vector<256x128xf32>
    %cst_6 = arith.constant 0.000000e+00 : f32
    %11 = vector.broadcast %cst_6 : f32 to vector<256x128xf32>
    %12 = arith.subf %11, %10 : vector<256x128xf32>
    %13 = math.exp %12 : vector<256x128xf32>
    %cst_7 = arith.constant 1.000000e+00 : f32
    %14 = vector.broadcast %cst_7 : f32 to vector<256x128xf32>
    %15 = arith.addf %14, %13 : vector<256x128xf32>
    %16 = tpu.reciprocal %15 {approx = true} : vector<256x128xf32> -> vector<256x128xf32>
    %17 = arith.mulf %16, %0 : vector<256x128xf32>
    %c0_8 = arith.constant 0 : index
    %c0_9 = arith.constant 0 : index
    %18 = vector.load %arg4[%c0_8, %c0_9] : memref<128x128xf32, #tpu.memory_space<vmem>>, vector<128x128xf32>
    %cst_10 = arith.constant dense<0.000000e+00> : vector<256x128xf32>
    %19 = tpu.matmul %17, %18, %cst_10 {dimension_numbers = #tpu.dot_dimension_numbers<[1], [0], [0], [1], [0, 0, 1, 1], [], []>} : vector<256x128xf32>, vector<128x128xf32>, vector<256x128xf32> -> vector<256x128xf32>
    %c0_11 = arith.constant 0 : index
    %c0_12 = arith.constant 0 : index
    %20 = vector.load %arg5[%c0_11, %c0_12] : memref<1x128xf32, #tpu.memory_space<vmem>>, vector<1x128xf32>
    %21 = vector.broadcast %20 : vector<1x128xf32> to vector<256x128xf32>
    %22 = arith.addf %19, %21 : vector<256x128xf32>
    %cst_13 = arith.constant 0.000000e+00 : f32
    %23 = vector.broadcast %cst_13 : f32 to vector<256x128xf32>
    %24 = arith.maximumf %22, %23 : vector<256x128xf32>
    %cst_14 = arith.constant 0.000000e+00 : f32
    %25 = vector.broadcast %cst_14 : f32 to vector<256x128xf32>
    %26 = arith.subf %25, %24 : vector<256x128xf32>
    %27 = math.exp %26 : vector<256x128xf32>
    %cst_15 = arith.constant 1.000000e+00 : f32
    %28 = vector.broadcast %cst_15 : f32 to vector<256x128xf32>
    %29 = arith.addf %28, %27 : vector<256x128xf32>
    %30 = tpu.reciprocal %29 {approx = true} : vector<256x128xf32> -> vector<256x128xf32>
    %31 = arith.mulf %30, %17 : vector<256x128xf32>
    %32 = arith.addf %0, %31 : vector<256x128xf32>
    %c0_16 = arith.constant 0 : index
    %c0_17 = arith.constant 0 : index
    %33 = vector.load %arg6[%c0_16, %c0_17] : memref<128x128xf32, #tpu.memory_space<vmem>>, vector<128x128xf32>
    %cst_18 = arith.constant dense<0.000000e+00> : vector<256x128xf32>
    %34 = tpu.matmul %32, %33, %cst_18 {dimension_numbers = #tpu.dot_dimension_numbers<[1], [0], [0], [1], [0, 0, 1, 1], [], []>} : vector<256x128xf32>, vector<128x128xf32>, vector<256x128xf32> -> vector<256x128xf32>
    %c0_19 = arith.constant 0 : index
    %c0_20 = arith.constant 0 : index
    %35 = vector.load %arg7[%c0_19, %c0_20] : memref<1x128xf32, #tpu.memory_space<vmem>>, vector<1x128xf32>
    %36 = vector.broadcast %35 : vector<1x128xf32> to vector<256x128xf32>
    %37 = arith.addf %34, %36 : vector<256x128xf32>
    %c0_21 = arith.constant 0 : index
    %c0_22 = arith.constant 0 : index
    %38 = vector.load %arg8[%c0_21, %c0_22] : memref<256x128xf32, #tpu.memory_space<vmem>>, vector<256x128xf32>
    tpu.vector_store %arg8[%c0_21, %c0_22], %37 {strides = array<i32>} : memref<256x128xf32, #tpu.memory_space<vmem>>, vector<256x128xf32>,
    return
  }
  func.func @transform_0(%arg0: i32) -> (i32, i32) {
    %c0_i32 = arith.constant 0 : i32
    %c0_i32_0 = arith.constant 0 : i32
    return %arg0, %c0_i32 : i32, i32
  }
  func.func @transform_1(%arg0: i32) -> (i32, i32) {
    %c0_i32 = arith.constant 0 : i32
    %c0_i32_0 = arith.constant 0 : i32
    %c0_i32_1 = arith.constant 0 : i32
    return %c0_i32, %c0_i32_0 : i32, i32
  }
  func.func @transform_2(%arg0: i32) -> (i32, i32) {
    %c0_i32 = arith.constant 0 : i32
    %c0_i32_0 = arith.constant 0 : i32
    %c0_i32_1 = arith.constant 0 : i32
    return %c0_i32, %c0_i32_0 : i32, i32
  }
  func.func @transform_3(%arg0: i32) -> (i32, i32) {
    %c0_i32 = arith.constant 0 : i32
    %c0_i32_0 = arith.constant 0 : i32
    %c0_i32_1 = arith.constant 0 : i32
    return %c0_i32, %c0_i32_0 : i32, i32
  }
  func.func @transform_4(%arg0: i32) -> (i32, i32) {
    %c0_i32 = arith.constant 0 : i32
    %c0_i32_0 = arith.constant 0 : i32
    %c0_i32_1 = arith.constant 0 : i32
    return %c0_i32, %c0_i32_0 : i32, i32
  }
  func.func @transform_5(%arg0: i32) -> (i32, i32) {
    %c0_i32 = arith.constant 0 : i32
    %c0_i32_0 = arith.constant 0 : i32
    %c0_i32_1 = arith.constant 0 : i32
    return %c0_i32, %c0_i32_0 : i32, i32
  }
  func.func @transform_6(%arg0: i32) -> (i32, i32) {
    %c0_i32 = arith.constant 0 : i32
    %c0_i32_0 = arith.constant 0 : i32
    %c0_i32_1 = arith.constant 0 : i32
    return %c0_i32, %c0_i32_0 : i32, i32
  }
  func.func @transform_7(%arg0: i32) -> (i32, i32) {
    %c0_i32 = arith.constant 0 : i32
    %c0_i32_0 = arith.constant 0 : i32
    return %arg0, %c0_i32 : i32, i32
  }
}

</mosaic_0001>

<bundles_post_ra>
// kernel: attention_block_forward.1
= control target key start
LH: loop header
LB: loop body
LE: loop exit
PB: predicated region body
PF: predicated region fallthrough
CT: control target
= control target key end

     0   :  { %v2078_v3 = vmov 0.0   ;;  %s3032_s1 = inlined_call_operand.vmem [shape: f32[128,256], index: 1, kind: input, shape index: {}]   ;;  %s3033_s0 = inlined_call_operand.vmem [shape: f32[256,128], index: 0, kind: input, shape index: {}]   ;;  %s3034_s3 = inlined_call_operand.vmem [shape: f32[128,128], index: 3, kind: input, shape index: {}]   ;;  %s3035_s2 = inlined_call_operand.vmem [shape: f32[1,256], index: 2, kind: input, shape index: {}]   ;;  %s3036_s5 = inlined_call_operand.vmem [shape: f32[128,128], index: 5, kind: input, shape index: {}]   ;;  %s3037_s4 = inlined_call_operand.vmem [shape: f32[1,128], index: 4, kind: input, shape index: {}]   ;;  %s3038_s6 = inlined_call_operand.vmem [shape: f32[1,128], index: 6, kind: input, shape index: {}]   ;;  %s3039_s7 = inlined_call_operand.vmem [shape: f32[256,128], index: 7, kind: output, shape index: {}]  }
   0x1   :  { %v59_v0 = vld [vmem:[%s3032_s1 + $0x8] sm:$0xff]  ;;  %v61_v1 = vld [vmem:[%s3032_s1 + $0x18] sm:$0xff]  ;;  %v58_v2 = vld [vmem:[%s3032_s1] sm:$0xff]  ;;  %166 = vmatprep.mubr.f32.mxu0 %v2078_v3 }
   0x2   :  { %v1693_v4 = vpack.c.bf16 %v61_v1, %v59_v0  ;;  %v60_v5 = vld [vmem:[%s3032_s1 + $0x10] sm:$0xff]  ;;  %v63_v6 = vld [vmem:[%s3032_s1 + $0x28] sm:$0xff]  ;;  %v65_v7 = vld [vmem:[%s3032_s1 + $0x38] sm:$0xff] }
   0x3   :  { %v1695_v8 = vpack.c.bf16 %v60_v5, %v58_v2  ;;  %v1697_v9 = vpack.c.bf16 %v65_v7, %v63_v6  ;;  %v62_v10 = vld [vmem:[%s3032_s1 + $0x20] sm:$0xff]  ;;  %v64_v11 = vld [vmem:[%s3032_s1 + $0x30] sm:$0xff]  ;;  %v67_v12 = vld [vmem:[%s3032_s1 + $0x48] sm:$0xff] }
   0x4   :  { %1694 = vmatprep.subr.bf16.mxu0 %v1693_v4  ;;  %v69_v13 = vld [vmem:[%s3032_s1 + $0x58] sm:$0xff]  ;;  %v1699_v14 = vpack.c.bf16 %v64_v11, %v62_v10  ;;  %v66_v16 = vld [vmem:[%s3032_s1 + $0x40] sm:$0xff]  ;;  %v68_v17 = vld [vmem:[%s3032_s1 + $0x50] sm:$0xff] }
   0x5   :  { %1696 = vmatpush1.bf16.msra.mxu0 %v1695_v8  ;;  %v1701_v15 = vpack.c.bf16 %v69_v13, %v67_v12  ;;  %v71_v18 = vld [vmem:[%s3032_s1 + $0x68] sm:$0xff]  ;;  %v73_v19 = vld [vmem:[%s3032_s1 + $0x78] sm:$0xff]  ;;  %v1703_v20 = vpack.c.bf16 %v68_v17, %v66_v16  ;;  %v70_v22 = vld [vmem:[%s3032_s1 + $0x60] sm:$0xff] }
   0x6   :  { %1698 = vmatprep.subr.bf16.mxu0 %v1697_v9  ;;  %v1705_v21 = vpack.c.bf16 %v73_v19, %v71_v18  ;;  %v72_v23 = vld [vmem:[%s3032_s1 + $0x70] sm:$0xff]  ;;  %v75_v24 = vld [vmem:[%s3032_s1 + $0x88] sm:$0xff]  ;;  %v77_v25 = vld [vmem:[%s3032_s1 + $0x98] sm:$0xff] }
   0x7   :  { %v1707_v26 = vpack.c.bf16 %v72_v23, %v70_v22  ;;  %v1709_v27 = vpack.c.bf16 %v77_v25, %v75_v24  ;;  %v74_v28 = vld [vmem:[%s3032_s1 + $0x80] sm:$0xff]  ;;  %v76_v29 = vld [vmem:[%s3032_s1 + $0x90] sm:$0xff]  ;;  %v79_v30 = vld [vmem:[%s3032_s1 + $0xa8] sm:$0xff] }
   0x8   :  { %v81_v31 = vld [vmem:[%s3032_s1 + $0xb8] sm:$0xff]  ;;  %v1711_v32 = vpack.c.bf16 %v76_v29, %v74_v28  ;;  %v78_v34 = vld [vmem:[%s3032_s1 + $0xa0] sm:$0xff]  ;;  %v80_v35 = vld [vmem:[%s3032_s1 + $0xb0] sm:$0xff] }
   0x9   :  { %1700 = vmatpush1.bf16.msra.mxu0 %v1699_v14  ;;  %v1713_v33 = vpack.c.bf16 %v81_v31, %v79_v30  ;;  %v83_v36 = vld [vmem:[%s3032_s1 + $0xc8] sm:$0xff]  ;;  %v85_v37 = vld [vmem:[%s3032_s1 + $0xd8] sm:$0xff]  ;;  %v1715_v38 = vpack.c.bf16 %v80_v35, %v78_v34  ;;  %v82_v40 = vld [vmem:[%s3032_s1 + $0xc0] sm:$0xff] }
   0xa   :  { %1702 = vmatprep.subr.bf16.mxu0 %v1701_v15  ;;  %v1717_v39 = vpack.c.bf16 %v85_v37, %v83_v36  ;;  %v84_v41 = vld [vmem:[%s3032_s1 + $0xd0] sm:$0xff]  ;;  %v87_v42 = vld [vmem:[%s3032_s1 + $0xe8] sm:$0xff]  ;;  %v89_v43 = vld [vmem:[%s3032_s1 + $0xf8] sm:$0xff] }
   0xb   :  { %v1719_v44 = vpack.c.bf16 %v84_v41, %v82_v40  ;;  %v1721_v45 = vpack.c.bf16 %v89_v43, %v87_v42  ;;  %v86_v46 = vld [vmem:[%s3032_s1 + $0xe0] sm:$0xff]  ;;  %v88_v47 = vld [vmem:[%s3032_s1 + $0xf0] sm:$0xff]  ;;  %v2226_v50 = vld [vmem:[%s3033_s0 + $0x8] sm:$0xff]  ;;  %v92_v42 = vlaneseq }
   0xc   :  { %v1723_v48 = vpack.c.bf16 %v88_v47, %v86_v46  ;;  %v2219_v49 = vld [vmem:[%s3033_s0] sm:$0xff]  ;;  %v2233_v51 = vld [vmem:[%s3033_s0 + $0x10] sm:$0xff]  ;;  %v2240_v52 = vld [vmem:[%s3033_s0 + $0x18] sm:$0xff] }
   0xd   :  { %1704 = vmatpush1.bf16.msra.mxu0 %v1703_v20  ;;  %v2247_v53 = vld [vmem:[%s3033_s0 + $0x20] sm:$0xff]  ;;  %v2254_v54 = vld [vmem:[%s3033_s0 + $0x28] sm:$0xff]  ;;  %v2261_v55 = vld [vmem:[%s3033_s0 + $0x30] sm:$0xff]  ;;  %v93_v43 = vshrl.u32 %v92_v42, 7 }
   0xe   :  { %1706 = vmatprep.subr.bf16.mxu0 %v1705_v21  ;;  %v2268_v56 = vld [vmem:[%s3033_s0 + $0x38] sm:$0xff]  ;;  %v2275_v57 = vld [vmem:[%s3033_s0 + $0x40] sm:$0xff]  ;;  %v2282_v58 = vld [vmem:[%s3033_s0 + $0x48] sm:$0xff] }
   0xf   :  { %v2289_v59 = vld [vmem:[%s3033_s0 + $0x50] sm:$0xff]  ;;  %v2296_v60 = vld [vmem:[%s3033_s0 + $0x58] sm:$0xff]  ;;  %v2303_v61 = vld [vmem:[%s3033_s0 + $0x60] sm:$0xff]  ;;  %v98_v46 = vsub.s32 1, %v93_v43 }
  0x10   :  { %v2310_v62 = vld [vmem:[%s3033_s0 + $0x68] sm:$0xff]  ;;  %v2317_v63 = vld [vmem:[%s3033_s0 + $0x70] sm:$0xff]  ;;  %v2324_v0 = vld [vmem:[%s3033_s0 + $0x78] sm:$0xff] }
  0x11   :  { %1708 = vmatpush1.bf16.msra.mxu0 %v1707_v26  ;;  %v2331_v1 = vld [vmem:[%s3033_s0 + $0x80] sm:$0xff]  ;;  %v2338_v2 = vld [vmem:[%s3033_s0 + $0x88] sm:$0xff]  ;;  %v2345_v4 = vld [vmem:[%s3033_s0 + $0x90] sm:$0xff] }
  0x12   :  { %1710 = vmatprep.subr.bf16.mxu0 %v1709_v27  ;;  %v2352_v5 = vld [vmem:[%s3033_s0 + $0x98] sm:$0xff]  ;;  %v2359_v6 = vld [vmem:[%s3033_s0 + $0xa0] sm:$0xff]  ;;  %v47_v7 = vld [vmem:[%s3033_s0 + $0xa8] sm:$0xff] }
  0x13   :  { %v48_v8 = vld [vmem:[%s3033_s0 + $0xb0] sm:$0xff]  ;;  %v49_v9 = vld [vmem:[%s3033_s0 + $0xb8] sm:$0xff]  ;;  %v647_v10 = vld [vmem:[%s3034_s3] sm:$0xff] }
  0x14   :  { %v648_v11 = vld [vmem:[%s3034_s3 + $0x8] sm:$0xff]  ;;  %v50_v13 = vld [vmem:[%s3033_s0 + $0xc0] sm:$0xff]  ;;  %v649_v14 = vld [vmem:[%s3034_s3 + $0x10] sm:$0xff] }
  0x15   :  { %1712 = vmatpush1.bf16.msra.mxu0 %v1711_v32  ;;  %v1725_v12 = vpack.c.bf16 %v648_v11, %v647_v10  ;;  %v650_v15 = vld [vmem:[%s3034_s3 + $0x18] sm:$0xff]  ;;  %v51_v17 = vld [vmem:[%s3033_s0 + $0xc8] sm:$0xff]  ;;  %v651_v18 = vld [vmem:[%s3034_s3 + $0x20] sm:$0xff] }
  0x16   :  { %1714 = vmatprep.subr.bf16.mxu0 %v1713_v33  ;;  %v1729_v16 = vpack.c.bf16 %v650_v15, %v649_v14  ;;  %v652_v19 = vld [vmem:[%s3034_s3 + $0x28] sm:$0xff]  ;;  %v52_v21 = vld [vmem:[%s3033_s0 + $0xd0] sm:$0xff]  ;;  %v654_v23 = vld [vmem:[%s3034_s3 + $0x38] sm:$0xff] }
  0x17   :  { %1726 = vmatprep.subr.bf16.mxu1 %v1725_v12  ;;  %v1733_v20 = vpack.c.bf16 %v652_v19, %v651_v18  ;;  %v653_v22 = vld [vmem:[%s3034_s3 + $0x30] sm:$0xff]  ;;  %v53_v25 = vld [vmem:[%s3033_s0 + $0xd8] sm:$0xff]  ;;  %v655_v26 = vld [vmem:[%s3034_s3 + $0x40] sm:$0xff] }
  0x18   :  { %1728 = vmatpush3.bf16.msra.mxu1 %v1725_v12  ;;  %v1737_v24 = vpack.c.bf16 %v654_v23, %v653_v22  ;;  %v656_v27 = vld [vmem:[%s3034_s3 + $0x48] sm:$0xff]  ;;  %v54_v29 = vld [vmem:[%s3033_s0 + $0xe0] sm:$0xff]  ;;  %v657_v30 = vld [vmem:[%s3034_s3 + $0x50] sm:$0xff] }
  0x19   :  { %1716 = vmatpush1.bf16.msra.mxu0 %v1715_v38  ;;  %1730 = vmatprep.subr.bf16.mxu1 %v1729_v16  ;;  %v1741_v28 = vpack.c.bf16 %v656_v27, %v655_v26  ;;  %v658_v31 = vld [vmem:[%s3034_s3 + $0x58] sm:$0xff]  ;;  %v55_v33 = vld [vmem:[%s3033_s0 + $0xe8] sm:$0xff]  ;;  %v659_v34 = vld [vmem:[%s3034_s3 + $0x60] sm:$0xff] }
  0x1a   :  { %1718 = vmatprep.subr.bf16.mxu0 %v1717_v39  ;;  %v1745_v32 = vpack.c.bf16 %v658_v31, %v657_v30  ;;  %v660_v35 = vld [vmem:[%s3034_s3 + $0x68] sm:$0xff]  ;;  %v56_v37 = vld [vmem:[%s3033_s0 + $0xf0] sm:$0xff]  ;;  %v662_v39 = vld [vmem:[%s3034_s3 + $0x78] sm:$0xff] }
  0x1b   :  { %v1749_v36 = vpack.c.bf16 %v660_v35, %v659_v34  ;;  %v661_v38 = vld [vmem:[%s3034_s3 + $0x70] sm:$0xff]  ;;  %v57_v41 = vld [vmem:[%s3033_s0 + $0xf8] sm:$0xff] }
  0x1c   :  { %1732 = vmatpush3.bf16.msra.mxu1 %v1729_v16  ;;  %v1753_v40 = vpack.c.bf16 %v662_v39, %v661_v38 }
  0x1d   :  { %1720 = vmatpush1.bf16.msra.mxu0 %v1719_v44  ;;  %1734 = vmatprep.subr.bf16.mxu1 %v1733_v20  ;;  %v94_v44 = vsub.s32 0, %v93_v43 }
  0x1e   :  { %1722 = vmatprep.subr.bf16.mxu0 %v1721_v45  ;;  %v90_v45 = vld [vmem:[%s3035_s2] sm:$0x3] }
  0x1f   :  { %v2457_v47 = vrot.slane %v90_v45, %v94_v44 }
  0x20   :  { %1736 = vmatpush3.bf16.msra.mxu1 %v1733_v20 }
  0x21   :  { %1724 = vmatpush1.bf16.msra.mxu0 %v1723_v48  ;;  %1738 = vmatprep.subr.bf16.mxu1 %v1737_v24  ;;  %v2459_v48 = vrot.slane %v90_v45, %v98_v46 }
  0x24   :  { %167 = vmatmul.mubr.f32.vlgmr.msra.gmra.mrb[0].mxu0 %v2219_v49  ;;  %1740 = vmatpush3.bf16.msra.mxu1 %v1737_v24 }
  0x25   :  { %172 = vmatprep.mubr.f32.mxu0 %v2078_v3  ;;  %1742 = vmatprep.subr.bf16.mxu1 %v1741_v28 }
  0x28   :  { %173 = vmatmul.mubr.f32.gmra.mrb[2].mxu0 %v2226_v50  ;;  %1744 = vmatpush3.bf16.msra.mxu1 %v1741_v28 }
  0x29   :  { %178 = vmatprep.mubr.f32.mxu0 %v2078_v3  ;;  %1746 = vmatprep.subr.bf16.mxu1 %v1745_v32 }
  0x2c   :  { %179 = vmatmul.mubr.f32.gmra.mrb[4].mxu0 %v2233_v51  ;;  %1748 = vmatpush3.bf16.msra.mxu1 %v1745_v32 }
  0x2d   :  { %184 = vmatprep.mubr.f32.mxu0 %v2078_v3  ;;  %1750 = vmatprep.subr.bf16.mxu1 %v1749_v36 }
  0x30   :  { %185 = vmatmul.mubr.f32.gmra.mrb[6].mxu0 %v2240_v52  ;;  %1752 = vmatpush3.bf16.msra.mxu1 %v1749_v36 }
  0x31   :  { %190 = vmatprep.mubr.f32.mxu0 %v2078_v3  ;;  %1754 = vmatprep.subr.bf16.mxu1 %v1753_v40 }
  0x34   :  { %191 = vmatmul.mubr.f32.gmra.mrb[8].mxu0 %v2247_v53  ;;  %1756 = vmatpush3.bf16.msra.mxu1 %v1753_v40 }
  0x35   :  { %196 = vmatprep.mubr.f32.mxu0 %v2078_v3 }
  0x38   :  { %197 = vmatmul.mubr.f32.gmra.mrb[10].mxu0 %v2254_v54 }
  0x39   :  { %202 = vmatprep.mubr.f32.mxu0 %v2078_v3 }
  0x3c   :  { %203 = vmatmul.mubr.f32.gmra.mrb[12].mxu0 %v2261_v55 }
  0x3d   :  { %208 = vmatprep.mubr.f32.mxu0 %v2078_v3 }
  0x40   :  { %209 = vmatmul.mubr.f32.gmra.mrb[14].mxu0 %v2268_v56 }
  0x41   :  { %214 = vmatprep.mubr.f32.mxu0 %v2078_v3 }
  0x44   :  { %215 = vmatmul.mubr.f32.gmra.mrb[16].mxu0 %v2275_v57 }
  0x45   :  { %220 = vmatprep.mubr.f32.mxu0 %v2078_v3 }
  0x48   :  { %221 = vmatmul.mubr.f32.gmra.mrb[18].mxu0 %v2282_v58 }
  0x49   :  { %226 = vmatprep.mubr.f32.mxu0 %v2078_v3 }
  0x4c   :  { %227 = vmatmul.mubr.f32.gmra.mrb[20].mxu0 %v2289_v59 }
  0x4d   :  { %232 = vmatprep.mubr.f32.mxu0 %v2078_v3 }
  0x50   :  { %233 = vmatmul.mubr.f32.gmra.mrb[22].mxu0 %v2296_v60 }
  0x51   :  { %238 = vmatprep.mubr.f32.mxu0 %v2078_v3 }
  0x54   :  { %239 = vmatmul.mubr.f32.gmra.mrb[24].mxu0 %v2303_v61 }
  0x55   :  { %244 = vmatprep.mubr.f32.mxu0 %v2078_v3 }
  0x58   :  { %245 = vmatmul.mubr.f32.gmra.mrb[26].mxu0 %v2310_v62 }
  0x59   :  { %250 = vmatprep.mubr.f32.mxu0 %v2078_v3 }
  0x5c   :  { %251 = vmatmul.mubr.f32.gmra.mrb[28].mxu0 %v2317_v63 }
  0x5d   :  { %256 = vmatprep.mubr.f32.mxu0 %v2078_v3 }
  0x60   :  { %257 = vmatmul.mubr.f32.gmra.mrb[30].mxu0 %v2324_v0 }
  0x61   :  { %262 = vmatprep.mubr.f32.mxu0 %v2078_v3 }
  0x64   :  { %263 = vmatmul.mubr.f32.gmra.mrb[32].mxu0 %v2331_v1 }
  0x65   :  { %268 = vmatprep.mubr.f32.mxu0 %v2078_v3 }
  0x68   :  { %269 = vmatmul.mubr.f32.gmra.mrb[34].mxu0 %v2338_v2 }
  0x69   :  { %274 = vmatprep.mubr.f32.mxu0 %v2078_v3 }
  0x6c   :  { %275 = vmatmul.mubr.f32.gmra.mrb[36].mxu0 %v2345_v4 }
  0x6d   :  { %280 = vmatprep.mubr.f32.mxu0 %v2078_v3 }
  0x70   :  { %281 = vmatmul.mubr.f32.gmra.mrb[38].mxu0 %v2352_v5 }
  0x71   :  { %286 = vmatprep.mubr.f32.mxu0 %v2078_v3 }
  0x74   :  { %287 = vmatmul.mubr.f32.gmra.mrb[40].mxu0 %v2359_v6 }
  0x75   :  { %292 = vmatprep.mubr.f32.mxu0 %v2078_v3 }
  0x78   :  { %293 = vmatmul.mubr.f32.gmra.mrb[42].mxu0 %v47_v7 }
  0x79   :  { %298 = vmatprep.mubr.f32.mxu0 %v2078_v3 }
  0x7c   :  { %299 = vmatmul.mubr.f32.gmra.mrb[44].mxu0 %v48_v8 }
  0x7d   :  { %304 = vmatprep.mubr.f32.mxu0 %v2078_v3 }
  0x80   :  { %305 = vmatmul.mubr.f32.gmra.mrb[46].mxu0 %v49_v9 }
  0x81   :  { %310 = vmatprep.mubr.f32.mxu0 %v2078_v3 }
  0x84   :  { %311 = vmatmul.mubr.f32.gmra.mrb[48].mxu0 %v50_v13 }
  0x85   :  { %316 = vmatprep.mubr.f32.mxu0 %v2078_v3 }
  0x88   :  { %317 = vmatmul.mubr.f32.gmra.mrb[50].mxu0 %v51_v17 }
  0x89   :  { %322 = vmatprep.mubr.f32.mxu0 %v2078_v3 }
  0x8c   :  { %323 = vmatmul.mubr.f32.gmra.mrb[52].mxu0 %v52_v21 }
  0x8d   :  { %328 = vmatprep.mubr.f32.mxu0 %v2078_v3 }
  0x90   :  { %329 = vmatmul.mubr.f32.gmra.mrb[54].mxu0 %v53_v25 }
  0x91   :  { %334 = vmatprep.mubr.f32.mxu0 %v2078_v3 }
  0x94   :  { %335 = vmatmul.mubr.f32.gmra.mrb[56].mxu0 %v54_v29 }
  0x95   :  { %340 = vmatprep.mubr.f32.mxu0 %v2078_v3 }
  0x98   :  { %341 = vmatmul.mubr.f32.gmra.mrb[58].mxu0 %v55_v33 }
  0x99   :  { %346 = vmatprep.mubr.f32.mxu0 %v2078_v3 }
  0x9c   :  { %347 = vmatmul.mubr.f32.gmra.mrb[60].mxu0 %v56_v37 }
  0x9d   :  { %352 = vmatprep.mubr.f32.mxu0 %v2078_v3 }
  0xa0   :  { %353 = vmatmul.mubr.f32.gmra.mrb[62].mxu0 %v57_v41 }
  0xf7   :  { %v168_v3 = vpop.f32.mrb[0].mxu0 }
  0xf8   :  { %v169_v7 = vadd.f32 %v168_v3, %v2457_v47  ;;  %v170_v8 = vpop.f32.mrb[1].mxu0 }
  0xf9   :  { %v171_v9 = vadd.f32 %v170_v8, %v2459_v48 }
  0xfa   :  { %v359_v10 = vmax.f32 %v169_v7, 0.0 }
  0xfb   :  { %v360_v11 = vmax.f32 %v171_v9, 0.0  ;;  %v174_v12 = vpop.f32.mrb[2].mxu0 }
  0xfc   :  { %v175_v13 = vadd.f32 %v174_v12, %v2457_v47  ;;  %v176_v14 = vpop.f32.mrb[3].mxu0 }
  0xfd   :  { %v423_v15 = vadd.f32 %v360_v11, %v359_v10  ;;  %v177_v16 = vadd.f32 %v176_v14, %v2459_v48 }
  0xfe   :  { %v361_v17 = vmax.f32 %v175_v13, 0.0 }
  0xff   :  { %v455_v18 = vsub.f32 0.0, %v423_v15  ;;  %v362_v19 = vmax.f32 %v177_v16, 0.0  ;;  %v180_v20 = vpop.f32.mrb[4].mxu0 }
 0x100   :  { %v181_v21 = vadd.f32 %v180_v20, %v2457_v47  ;;  %v182_v22 = vpop.f32.mrb[5].mxu0 }
 0x101   :  { %v487_v23 = vmul.f32 1.442695, %v455_v18  ;;  %v424_v24 = vadd.f32 %v362_v19, %v361_v17  ;;  %v183_v25 = vadd.f32 %v182_v22, %v2459_v48 }
 0x102   :  { %v363_v26 = vmax.f32 %v181_v21, 0.0 }
 0x103   :  { %1790 = vpow2.f32 %v487_v23  ;;  %v456_v27 = vsub.f32 0.0, %v424_v24  ;;  %v364_v28 = vmax.f32 %v183_v25, 0.0  ;;  %v186_v29 = vpop.f32.mrb[6].mxu0 }
 0x104   :  { %v187_v30 = vadd.f32 %v186_v29, %v2457_v47  ;;  %v188_v31 = vpop.f32.mrb[7].mxu0 }
 0x105   :  { %v489_v32 = vmul.f32 1.442695, %v456_v27  ;;  %v425_v33 = vadd.f32 %v364_v28, %v363_v26  ;;  %v189_v34 = vadd.f32 %v188_v31, %v2459_v48 }
 0x106   :  { %v365_v35 = vmax.f32 %v187_v30, 0.0 }
 0x107   :  { %1792 = vpow2.f32 %v489_v32  ;;  %v457_v36 = vsub.f32 0.0, %v425_v33  ;;  %v366_v37 = vmax.f32 %v189_v34, 0.0  ;;  %v192_v38 = vpop.f32.mrb[8].mxu0 }
 0x108   :  { %v193_v39 = vadd.f32 %v192_v38, %v2457_v47  ;;  %v194_v40 = vpop.f32.mrb[9].mxu0 }
 0x109   :  { %v491_v41 = vmul.f32 1.442695, %v457_v36  ;;  %v426_v42 = vadd.f32 %v366_v37, %v365_v35  ;;  %v195_v43 = vadd.f32 %v194_v40, %v2459_v48 }
 0x10a   :  { %v367_v44 = vmax.f32 %v193_v39, 0.0 }
 0x10b   :  { %1794 = vpow2.f32 %v491_v41  ;;  %v458_v45 = vsub.f32 0.0, %v426_v42  ;;  %v368_v46 = vmax.f32 %v195_v43, 0.0  ;;  %v198_v3 = vpop.f32.mrb[10].mxu0 }
 0x10c   :  { %v199_v7 = vadd.f32 %v198_v3, %v2457_v47  ;;  %v200_v8 = vpop.f32.mrb[11].mxu0 }
 0x10d   :  { %v1791_v9 = vpop.eup %1790  ;;  %v493_v10 = vmul.f32 1.442695, %v458_v45  ;;  %v427_v11 = vadd.f32 %v368_v46, %v367_v44  ;;  %v201_v12 = vadd.f32 %v200_v8, %v2459_v48 }
 0x10e   :  { %v551_v13 = vadd.f32 1.0, %v1791_v9  ;;  %v369_v14 = vmax.f32 %v199_v7, 0.0 }
 0x10f   :  { %1796 = vpow2.f32 %v493_v10  ;;  %v459_v15 = vsub.f32 0.0, %v427_v11  ;;  %v370_v16 = vmax.f32 %v201_v12, 0.0  ;;  %v204_v17 = vpop.f32.mrb[12].mxu0 }
 0x110   :  { %1798 = vrcp.f32 %v551_v13  ;;  %v205_v18 = vadd.f32 %v204_v17, %v2457_v47  ;;  %v206_v19 = vpop.f32.mrb[13].mxu0 }
 0x111   :  { %v1793_v20 = vpop.eup %1792  ;;  %v495_v21 = vmul.f32 1.442695, %v459_v15  ;;  %v428_v22 = vadd.f32 %v370_v16, %v369_v14  ;;  %v207_v23 = vadd.f32 %v206_v19, %v2459_v48 }
 0x112   :  { %v552_v24 = vadd.f32 1.0, %v1793_v20  ;;  %v371_v25 = vmax.f32 %v205_v18, 0.0 }
 0x113   :  { %1800 = vpow2.f32 %v495_v21  ;;  %v460_v26 = vsub.f32 0.0, %v428_v22  ;;  %v372_v27 = vmax.f32 %v207_v23, 0.0  ;;  %v210_v28 = vpop.f32.mrb[14].mxu0 }
 0x114   :  { %1802 = vrcp.f32 %v552_v24  ;;  %v211_v29 = vadd.f32 %v210_v28, %v2457_v47  ;;  %v212_v30 = vpop.f32.mrb[15].mxu0 }
 0x115   :  { %v1795_v31 = vpop.eup %1794  ;;  %v497_v32 = vmul.f32 1.442695, %v460_v26  ;;  %v429_v33 = vadd.f32 %v372_v27, %v371_v25  ;;  %v213_v34 = vadd.f32 %v212_v30, %v2459_v48 }
 0x116   :  { %v553_v35 = vadd.f32 1.0, %v1795_v31  ;;  %v373_v36 = vmax.f32 %v211_v29, 0.0 }
 0x117   :  { %1804 = vpow2.f32 %v497_v32  ;;  %v461_v37 = vsub.f32 0.0, %v429_v33  ;;  %v374_v38 = vmax.f32 %v213_v34, 0.0  ;;  %v216_v39 = vpop.f32.mrb[16].mxu0 }
 0x118   :  { %1806 = vrcp.f32 %v553_v35  ;;  %v217_v40 = vadd.f32 %v216_v39, %v2457_v47  ;;  %v218_v41 = vpop.f32.mrb[17].mxu0 }
 0x119   :  { %v1797_v42 = vpop.eup %1796  ;;  %v499_v43 = vmul.f32 1.442695, %v461_v37  ;;  %v430_v44 = vadd.f32 %v374_v38, %v373_v36  ;;  %v219_v45 = vadd.f32 %v218_v41, %v2459_v48 }
 0x11a   :  { %v1799_v46 = vpop.eup %1798  ;;  %v554_v3 = vadd.f32 1.0, %v1797_v42  ;;  %v375_v7 = vmax.f32 %v217_v40, 0.0 }
 0x11b   :  { %1808 = vpow2.f32 %v499_v43  ;;  %v462_v8 = vsub.f32 0.0, %v430_v44  ;;  %v376_v9 = vmax.f32 %v219_v45, 0.0  ;;  %v222_v10 = vpop.f32.mrb[18].mxu0  ;;  %v2480_v11 = vmul.f32 %v1799_v46, %v2219_v49 }
 0x11c   :  { %1810 = vrcp.f32 %v554_v3  ;;  %v223_v12 = vadd.f32 %v222_v10, %v2457_v47  ;;  %v224_v13 = vpop.f32.mrb[19].mxu0 }
 0x11d   :  { %v1801_v14 = vpop.eup %1800  ;;  %v501_v15 = vmul.f32 1.442695, %v462_v8  ;;  %v431_v16 = vadd.f32 %v376_v9, %v375_v7  ;;  %v225_v17 = vadd.f32 %v224_v13, %v2459_v48  ;;  %1565 = vmatprep.mubr.f32.mxu1 %v2480_v11 }
 0x11e   :  { %v1803_v18 = vpop.eup %1802  ;;  %v555_v19 = vadd.f32 1.0, %v1801_v14  ;;  %v377_v20 = vmax.f32 %v223_v12, 0.0 }
 0x11f   :  { %1812 = vpow2.f32 %v501_v15  ;;  %v463_v21 = vsub.f32 0.0, %v431_v16  ;;  %v378_v22 = vmax.f32 %v225_v17, 0.0  ;;  %v228_v23 = vpop.f32.mrb[20].mxu0  ;;  %v2486_v49 = vmul.f32 %v1803_v18, %v2226_v50 }
 0x120   :  { %1814 = vrcp.f32 %v555_v19  ;;  %v229_v24 = vadd.f32 %v228_v23, %v2457_v47  ;;  %v230_v25 = vpop.f32.mrb[21].mxu0 }
 0x121   :  { %v1805_v26 = vpop.eup %1804  ;;  %v503_v27 = vmul.f32 1.442695, %v463_v21  ;;  %v432_v28 = vadd.f32 %v378_v22, %v377_v20  ;;  %v231_v29 = vadd.f32 %v230_v25, %v2459_v48  ;;  %1566 = vmatmul.mubr.f32.vlgmr.msra.gmra.mrb[0].mxu1 %v2486_v49 }
 0x122   :  { %v1807_v30 = vpop.eup %1806  ;;  %v556_v31 = vadd.f32 1.0, %v1805_v26  ;;  %v379_v32 = vmax.f32 %v229_v24, 0.0 }
 0x123   :  { %1816 = vpow2.f32 %v503_v27  ;;  %v464_v33 = vsub.f32 0.0, %v432_v28  ;;  %v380_v34 = vmax.f32 %v231_v29, 0.0  ;;  %v234_v35 = vpop.f32.mrb[22].mxu0  ;;  %v2492_v50 = vmul.f32 %v1807_v30, %v2233_v51 }
 0x124   :  { %1818 = vrcp.f32 %v556_v31  ;;  %v235_v36 = vadd.f32 %v234_v35, %v2457_v47  ;;  %v236_v37 = vpop.f32.mrb[23].mxu0 }
 0x125   :  { %v1809_v38 = vpop.eup %1808  ;;  %v505_v39 = vmul.f32 1.442695, %v464_v33  ;;  %v433_v40 = vadd.f32 %v380_v34, %v379_v32  ;;  %v237_v41 = vadd.f32 %v236_v37, %v2459_v48  ;;  %1568 = vmatprep.mubr.f32.mxu1 %v2492_v50 }
 0x126   :  { %v1811_v42 = vpop.eup %1810  ;;  %v557_v43 = vadd.f32 1.0, %v1809_v38  ;;  %v381_v44 = vmax.f32 %v235_v36, 0.0 }
 0x127   :  { %1820 = vpow2.f32 %v505_v39  ;;  %v465_v45 = vsub.f32 0.0, %v433_v40  ;;  %v382_v46 = vmax.f32 %v237_v41, 0.0  ;;  %v240_v3 = vpop.f32.mrb[24].mxu0  ;;  %v2498_v51 = vmul.f32 %v1811_v42, %v2240_v52 }
 0x128   :  { %1822 = vrcp.f32 %v557_v43  ;;  %v241_v7 = vadd.f32 %v240_v3, %v2457_v47  ;;  %v242_v8 = vpop.f32.mrb[25].mxu0 }
 0x129   :  { %v1813_v9 = vpop.eup %1812  ;;  %v507_v10 = vmul.f32 1.442695, %v465_v45  ;;  %v434_v12 = vadd.f32 %v382_v46, %v381_v44  ;;  %v243_v13 = vadd.f32 %v242_v8, %v2459_v48  ;;  %1569 = vmatmul.mubr.f32.gmra.mrb[2].mxu1 %v2498_v51 }
 0x12a   :  { %v1815_v14 = vpop.eup %1814  ;;  %v558_v15 = vadd.f32 1.0, %v1813_v9  ;;  %v383_v16 = vmax.f32 %v241_v7, 0.0 }
 0x12b   :  { %1824 = vpow2.f32 %v507_v10  ;;  %v466_v17 = vsub.f32 0.0, %v434_v12  ;;  %v384_v18 = vmax.f32 %v243_v13, 0.0  ;;  %v246_v19 = vpop.f32.mrb[26].mxu0  ;;  %v2504_v52 = vmul.f32 %v1815_v14, %v2247_v53 }
 0x12c   :  { %1826 = vrcp.f32 %v558_v15  ;;  %v247_v20 = vadd.f32 %v246_v19, %v2457_v47  ;;  %v248_v21 = vpop.f32.mrb[27].mxu0 }
 0x12d   :  { %v1817_v22 = vpop.eup %1816  ;;  %v509_v23 = vmul.f32 1.442695, %v466_v17  ;;  %v435_v24 = vadd.f32 %v384_v18, %v383_v16  ;;  %v249_v25 = vadd.f32 %v248_v21, %v2459_v48  ;;  %1571 = vmatprep.mubr.f32.mxu1 %v2504_v52 }
 0x12e   :  { %v1819_v26 = vpop.eup %1818  ;;  %v559_v27 = vadd.f32 1.0, %v1817_v22  ;;  %v385_v28 = vmax.f32 %v247_v20, 0.0 }
 0x12f   :  { %1828 = vpow2.f32 %v509_v23  ;;  %v467_v29 = vsub.f32 0.0, %v435_v24  ;;  %v386_v30 = vmax.f32 %v249_v25, 0.0  ;;  %v252_v31 = vpop.f32.mrb[28].mxu0  ;;  %v2510_v53 = vmul.f32 %v1819_v26, %v2254_v54 }
 0x130   :  { %1830 = vrcp.f32 %v559_v27  ;;  %v253_v32 = vadd.f32 %v252_v31, %v2457_v47  ;;  %v254_v33 = vpop.f32.mrb[29].mxu0 }
 0x131   :  { %v1821_v34 = vpop.eup %1820  ;;  %v511_v35 = vmul.f32 1.442695, %v467_v29  ;;  %v436_v36 = vadd.f32 %v386_v30, %v385_v28  ;;  %v255_v37 = vadd.f32 %v254_v33, %v2459_v48  ;;  %1572 = vmatmul.mubr.f32.gmra.mrb[4].mxu1 %v2510_v53 }
 0x132   :  { %v1823_v38 = vpop.eup %1822  ;;  %v560_v39 = vadd.f32 1.0, %v1821_v34  ;;  %v387_v40 = vmax.f32 %v253_v32, 0.0 }
 0x133   :  { %1832 = vpow2.f32 %v511_v35  ;;  %v468_v41 = vsub.f32 0.0, %v436_v36  ;;  %v388_v42 = vmax.f32 %v255_v37, 0.0  ;;  %v258_v43 = vpop.f32.mrb[30].mxu0  ;;  %v2516_v54 = vmul.f32 %v1823_v38, %v2261_v55 }
 0x134   :  { %1834 = vrcp.f32 %v560_v39  ;;  %v259_v44 = vadd.f32 %v258_v43, %v2457_v47  ;;  %v260_v45 = vpop.f32.mrb[31].mxu0 }
 0x135   :  { %v1825_v46 = vpop.eup %1824  ;;  %v513_v3 = vmul.f32 1.442695, %v468_v41  ;;  %v437_v7 = vadd.f32 %v388_v42, %v387_v40  ;;  %v261_v8 = vadd.f32 %v260_v45, %v2459_v48  ;;  %1574 = vmatprep.mubr.f32.mxu1 %v2516_v54 }
 0x136   :  { %v1827_v9 = vpop.eup %1826  ;;  %v561_v10 = vadd.f32 1.0, %v1825_v46  ;;  %v389_v12 = vmax.f32 %v259_v44, 0.0 }
 0x137   :  { %1836 = vpow2.f32 %v513_v3  ;;  %v469_v13 = vsub.f32 0.0, %v437_v7  ;;  %v390_v14 = vmax.f32 %v261_v8, 0.0  ;;  %v264_v15 = vpop.f32.mrb[32].mxu0  ;;  %v2522_v55 = vmul.f32 %v1827_v9, %v2268_v56 }
 0x138   :  { %1838 = vrcp.f32 %v561_v10  ;;  %v265_v16 = vadd.f32 %v264_v15, %v2457_v47  ;;  %v266_v17 = vpop.f32.mrb[33].mxu0 }
 0x139   :  { %v1829_v18 = vpop.eup %1828  ;;  %v515_v19 = vmul.f32 1.442695, %v469_v13  ;;  %v438_v20 = vadd.f32 %v390_v14, %v389_v12  ;;  %v267_v21 = vadd.f32 %v266_v17, %v2459_v48  ;;  %1575 = vmatmul.mubr.f32.gmra.mrb[6].mxu1 %v2522_v55 }
 0x13a   :  { %v1831_v22 = vpop.eup %1830  ;;  %v562_v23 = vadd.f32 1.0, %v1829_v18  ;;  %v391_v24 = vmax.f32 %v265_v16, 0.0 }
 0x13b   :  { %1840 = vpow2.f32 %v515_v19  ;;  %v470_v25 = vsub.f32 0.0, %v438_v20  ;;  %v392_v26 = vmax.f32 %v267_v21, 0.0  ;;  %v270_v27 = vpop.f32.mrb[34].mxu0  ;;  %v2528_v56 = vmul.f32 %v1831_v22, %v2275_v57 }
 0x13c   :  { %1842 = vrcp.f32 %v562_v23  ;;  %v271_v28 = vadd.f32 %v270_v27, %v2457_v47  ;;  %v272_v29 = vpop.f32.mrb[35].mxu0 }
 0x13d   :  { %v1833_v30 = vpop.eup %1832  ;;  %v517_v31 = vmul.f32 1.442695, %v470_v25  ;;  %v439_v32 = vadd.f32 %v392_v26, %v391_v24  ;;  %v273_v33 = vadd.f32 %v272_v29, %v2459_v48  ;;  %1577 = vmatprep.mubr.f32.mxu1 %v2528_v56 }
 0x13e   :  { %v1835_v34 = vpop.eup %1834  ;;  %v563_v35 = vadd.f32 1.0, %v1833_v30  ;;  %v393_v36 = vmax.f32 %v271_v28, 0.0 }
 0x13f   :  { %1844 = vpow2.f32 %v517_v31  ;;  %v471_v37 = vsub.f32 0.0, %v439_v32  ;;  %v394_v38 = vmax.f32 %v273_v33, 0.0  ;;  %v276_v39 = vpop.f32.mrb[36].mxu0  ;;  %v2534_v57 = vmul.f32 %v1835_v34, %v2282_v58 }
 0x140   :  { %1846 = vrcp.f32 %v563_v35  ;;  %v277_v40 = vadd.f32 %v276_v39, %v2457_v47  ;;  %v278_v41 = vpop.f32.mrb[37].mxu0 }
 0x141   :  { %v1837_v42 = vpop.eup %1836  ;;  %v519_v43 = vmul.f32 1.442695, %v471_v37  ;;  %v440_v44 = vadd.f32 %v394_v38, %v393_v36  ;;  %v279_v45 = vadd.f32 %v278_v41, %v2459_v48  ;;  %1578 = vmatmul.mubr.f32.gmra.mrb[8].mxu1 %v2534_v57 }
 0x142   :  { %v1839_v46 = vpop.eup %1838  ;;  %v564_v3 = vadd.f32 1.0, %v1837_v42  ;;  %v395_v7 = vmax.f32 %v277_v40, 0.0 }
 0x143   :  { %1848 = vpow2.f32 %v519_v43  ;;  %v472_v8 = vsub.f32 0.0, %v440_v44  ;;  %v396_v9 = vmax.f32 %v279_v45, 0.0  ;;  %v282_v10 = vpop.f32.mrb[38].mxu0  ;;  %v2540_v58 = vmul.f32 %v1839_v46, %v2289_v59 }
 0x144   :  { %1850 = vrcp.f32 %v564_v3  ;;  %v283_v12 = vadd.f32 %v282_v10, %v2457_v47  ;;  %v284_v13 = vpop.f32.mrb[39].mxu0 }
 0x145   :  { %v1841_v14 = vpop.eup %1840  ;;  %v521_v15 = vmul.f32 1.442695, %v472_v8  ;;  %v441_v16 = vadd.f32 %v396_v9, %v395_v7  ;;  %v285_v17 = vadd.f32 %v284_v13, %v2459_v48  ;;  %1580 = vmatprep.mubr.f32.mxu1 %v2540_v58 }
 0x146   :  { %v1843_v18 = vpop.eup %1842  ;;  %v565_v19 = vadd.f32 1.0, %v1841_v14  ;;  %v397_v20 = vmax.f32 %v283_v12, 0.0 }
 0x147   :  { %1852 = vpow2.f32 %v521_v15  ;;  %v473_v21 = vsub.f32 0.0, %v441_v16  ;;  %v398_v22 = vmax.f32 %v285_v17, 0.0  ;;  %v288_v23 = vpop.f32.mrb[40].mxu0  ;;  %v2546_v59 = vmul.f32 %v1843_v18, %v2296_v60 }
 0x148   :  { %1854 = vrcp.f32 %v565_v19  ;;  %v289_v24 = vadd.f32 %v288_v23, %v2457_v47  ;;  %v290_v25 = vpop.f32.mrb[41].mxu0 }
 0x149   :  { %v1845_v26 = vpop.eup %1844  ;;  %v523_v27 = vmul.f32 1.442695, %v473_v21  ;;  %v442_v28 = vadd.f32 %v398_v22, %v397_v20  ;;  %v291_v29 = vadd.f32 %v290_v25, %v2459_v48  ;;  %1581 = vmatmul.mubr.f32.gmra.mrb[10].mxu1 %v2546_v59 }
 0x14a   :  { %v1847_v30 = vpop.eup %1846  ;;  %v566_v31 = vadd.f32 1.0, %v1845_v26  ;;  %v399_v32 = vmax.f32 %v289_v24, 0.0 }
 0x14b   :  { %1856 = vpow2.f32 %v523_v27  ;;  %v474_v33 = vsub.f32 0.0, %v442_v28  ;;  %v400_v34 = vmax.f32 %v291_v29, 0.0  ;;  %v294_v35 = vpop.f32.mrb[42].mxu0  ;;  %v2552_v60 = vmul.f32 %v1847_v30, %v2303_v61 }
 0x14c   :  { %1858 = vrcp.f32 %v566_v31  ;;  %v295_v36 = vadd.f32 %v294_v35, %v2457_v47  ;;  %v296_v37 = vpop.f32.mrb[43].mxu0 }
 0x14d   :  { %v1849_v38 = vpop.eup %1848  ;;  %v525_v39 = vmul.f32 1.442695, %v474_v33  ;;  %v443_v40 = vadd.f32 %v400_v34, %v399_v32  ;;  %v297_v41 = vadd.f32 %v296_v37, %v2459_v48  ;;  %1583 = vmatprep.mubr.f32.mxu1 %v2552_v60 }
 0x14e   :  { %v1851_v42 = vpop.eup %1850  ;;  %v567_v43 = vadd.f32 1.0, %v1849_v38  ;;  %v401_v44 = vmax.f32 %v295_v36, 0.0 }
 0x14f   :  { %1860 = vpow2.f32 %v525_v39  ;;  %v475_v45 = vsub.f32 0.0, %v443_v40  ;;  %v402_v46 = vmax.f32 %v297_v41, 0.0  ;;  %v300_v3 = vpop.f32.mrb[44].mxu0  ;;  %v2558_v61 = vmul.f32 %v1851_v42, %v2310_v62 }
 0x150   :  { %1862 = vrcp.f32 %v567_v43  ;;  %v301_v7 = vadd.f32 %v300_v3, %v2457_v47  ;;  %v302_v8 = vpop.f32.mrb[45].mxu0 }
 0x151   :  { %v1853_v9 = vpop.eup %1852  ;;  %v527_v10 = vmul.f32 1.442695, %v475_v45  ;;  %v444_v12 = vadd.f32 %v402_v46, %v401_v44  ;;  %v303_v13 = vadd.f32 %v302_v8, %v2459_v48  ;;  %1584 = vmatmul.mubr.f32.gmra.mrb[12].mxu1 %v2558_v61 }
 0x152   :  { %v1855_v14 = vpop.eup %1854  ;;  %v568_v15 = vadd.f32 1.0, %v1853_v9  ;;  %v403_v16 = vmax.f32 %v301_v7, 0.0 }
 0x153   :  { %1864 = vpow2.f32 %v527_v10  ;;  %v476_v17 = vsub.f32 0.0, %v444_v12  ;;  %v404_v18 = vmax.f32 %v303_v13, 0.0  ;;  %v306_v19 = vpop.f32.mrb[46].mxu0  ;;  %v2564_v62 = vmul.f32 %v1855_v14, %v2317_v63 }
 0x154   :  { %1866 = vrcp.f32 %v568_v15  ;;  %v307_v20 = vadd.f32 %v306_v19, %v2457_v47  ;;  %v308_v21 = vpop.f32.mrb[47].mxu0 }
 0x155   :  { %v1857_v22 = vpop.eup %1856  ;;  %v529_v23 = vmul.f32 1.442695, %v476_v17  ;;  %v445_v24 = vadd.f32 %v404_v18, %v403_v16  ;;  %v309_v25 = vadd.f32 %v308_v21, %v2459_v48  ;;  %1586 = vmatprep.mubr.f32.mxu1 %v2564_v62 }
 0x156   :  { %v1859_v26 = vpop.eup %1858  ;;  %v569_v27 = vadd.f32 1.0, %v1857_v22  ;;  %v405_v28 = vmax.f32 %v307_v20, 0.0 }
 0x157   :  { %1868 = vpow2.f32 %v529_v23  ;;  %v477_v29 = vsub.f32 0.0, %v445_v24  ;;  %v406_v30 = vmax.f32 %v309_v25, 0.0  ;;  %v312_v31 = vpop.f32.mrb[48].mxu0  ;;  %v2570_v63 = vmul.f32 %v1859_v26, %v2324_v0 }
 0x158   :  { %1870 = vrcp.f32 %v569_v27  ;;  %v313_v32 = vadd.f32 %v312_v31, %v2457_v47  ;;  %v314_v33 = vpop.f32.mrb[49].mxu0 }
 0x159   :  { %v1861_v34 = vpop.eup %1860  ;;  %v531_v35 = vmul.f32 1.442695, %v477_v29  ;;  %v446_v36 = vadd.f32 %v406_v30, %v405_v28  ;;  %v315_v37 = vadd.f32 %v314_v33, %v2459_v48  ;;  %1587 = vmatmul.mubr.f32.gmra.mrb[14].mxu1 %v2570_v63 }
 0x15a   :  { %v1863_v38 = vpop.eup %1862  ;;  %v570_v39 = vadd.f32 1.0, %v1861_v34  ;;  %v407_v40 = vmax.f32 %v313_v32, 0.0 }
 0x15b   :  { %1872 = vpow2.f32 %v531_v35  ;;  %v478_v41 = vsub.f32 0.0, %v446_v36  ;;  %v408_v42 = vmax.f32 %v315_v37, 0.0  ;;  %v318_v43 = vpop.f32.mrb[50].mxu0  ;;  %v2576_v0 = vmul.f32 %v1863_v38, %v2331_v1 }
 0x15c   :  { %1874 = vrcp.f32 %v570_v39  ;;  %v319_v44 = vadd.f32 %v318_v43, %v2457_v47  ;;  %v320_v45 = vpop.f32.mrb[51].mxu0 }
 0x15d   :  { %v1865_v46 = vpop.eup %1864  ;;  %v533_v3 = vmul.f32 1.442695, %v478_v41  ;;  %v447_v7 = vadd.f32 %v408_v42, %v407_v40  ;;  %v321_v8 = vadd.f32 %v320_v45, %v2459_v48  ;;  %1589 = vmatprep.mubr.f32.mxu1 %v2576_v0 }
 0x15e   :  { %v1867_v9 = vpop.eup %1866  ;;  %v571_v10 = vadd.f32 1.0, %v1865_v46  ;;  %v409_v12 = vmax.f32 %v319_v44, 0.0 }
 0x15f   :  { %1876 = vpow2.f32 %v533_v3  ;;  %v479_v13 = vsub.f32 0.0, %v447_v7  ;;  %v410_v14 = vmax.f32 %v321_v8, 0.0  ;;  %v324_v15 = vpop.f32.mrb[52].mxu0  ;;  %v2582_v1 = vmul.f32 %v1867_v9, %v2338_v2 }
 0x160   :  { %1878 = vrcp.f32 %v571_v10  ;;  %v325_v16 = vadd.f32 %v324_v15, %v2457_v47  ;;  %v326_v17 = vpop.f32.mrb[53].mxu0 }
 0x161   :  { %v1869_v18 = vpop.eup %1868  ;;  %v535_v19 = vmul.f32 1.442695, %v479_v13  ;;  %v448_v20 = vadd.f32 %v410_v14, %v409_v12  ;;  %v327_v21 = vadd.f32 %v326_v17, %v2459_v48  ;;  %1590 = vmatmul.mubr.f32.gmra.mrb[16].mxu1 %v2582_v1 }
 0x162   :  { %v1871_v22 = vpop.eup %1870  ;;  %v572_v23 = vadd.f32 1.0, %v1869_v18  ;;  %v411_v24 = vmax.f32 %v325_v16, 0.0 }
 0x163   :  { %1880 = vpow2.f32 %v535_v19  ;;  %v480_v25 = vsub.f32 0.0, %v448_v20  ;;  %v412_v26 = vmax.f32 %v327_v21, 0.0  ;;  %v330_v27 = vpop.f32.mrb[54].mxu0  ;;  %v2588_v2 = vmul.f32 %v1871_v22, %v2345_v4 }
 0x164   :  { %1882 = vrcp.f32 %v572_v23  ;;  %v331_v28 = vadd.f32 %v330_v27, %v2457_v47  ;;  %v332_v29 = vpop.f32.mrb[55].mxu0 }
 0x165   :  { %v1873_v30 = vpop.eup %1872  ;;  %v537_v31 = vmul.f32 1.442695, %v480_v25  ;;  %v449_v32 = vadd.f32 %v412_v26, %v411_v24  ;;  %v333_v33 = vadd.f32 %v332_v29, %v2459_v48  ;;  %1592 = vmatprep.mubr.f32.mxu1 %v2588_v2 }
 0x166   :  { %v1875_v34 = vpop.eup %1874  ;;  %v573_v35 = vadd.f32 1.0, %v1873_v30  ;;  %v413_v36 = vmax.f32 %v331_v28, 0.0 }
 0x167   :  { %1884 = vpow2.f32 %v537_v31  ;;  %v481_v37 = vsub.f32 0.0, %v449_v32  ;;  %v414_v38 = vmax.f32 %v333_v33, 0.0  ;;  %v336_v39 = vpop.f32.mrb[56].mxu0  ;;  %v2594_v4 = vmul.f32 %v1875_v34, %v2352_v5 }
 0x168   :  { %1886 = vrcp.f32 %v573_v35  ;;  %v337_v40 = vadd.f32 %v336_v39, %v2457_v47  ;;  %v338_v41 = vpop.f32.mrb[57].mxu0 }
 0x169   :  { %v1877_v42 = vpop.eup %1876  ;;  %v539_v43 = vmul.f32 1.442695, %v481_v37  ;;  %v450_v44 = vadd.f32 %v414_v38, %v413_v36  ;;  %v339_v45 = vadd.f32 %v338_v41, %v2459_v48  ;;  %1593 = vmatmul.mubr.f32.gmra.mrb[18].mxu1 %v2594_v4  ;;  %v2619_v37 = vld [vmem:[%s3033_s0 + $0xb0] sm:$0xff] }
 0x16a   :  { %v1879_v46 = vpop.eup %1878  ;;  %v574_v3 = vadd.f32 1.0, %v1877_v42  ;;  %v415_v7 = vmax.f32 %v337_v40, 0.0 }
 0x16b   :  { %1888 = vpow2.f32 %v539_v43  ;;  %v482_v8 = vsub.f32 0.0, %v450_v44  ;;  %v416_v9 = vmax.f32 %v339_v45, 0.0  ;;  %v342_v10 = vpop.f32.mrb[58].mxu0  ;;  %v2600_v5 = vmul.f32 %v1879_v46, %v2359_v6  ;;  %v2608_v6 = vld [vmem:[%s3033_s0 + $0xa8] sm:$0xff] }
 0x16c   :  { %1890 = vrcp.f32 %v574_v3  ;;  %v343_v12 = vadd.f32 %v342_v10, %v2457_v47  ;;  %v344_v13 = vpop.f32.mrb[59].mxu0  ;;  %v1152_v10 = vld [vmem:[%s3036_s5 + $0x8] sm:$0xff] }
 0x16d   :  { %v1881_v14 = vpop.eup %1880  ;;  %v541_v15 = vmul.f32 1.442695, %v482_v8  ;;  %v451_v16 = vadd.f32 %v416_v9, %v415_v7  ;;  %v345_v17 = vadd.f32 %v344_v13, %v2459_v48  ;;  %1595 = vmatprep.mubr.f32.mxu1 %v2600_v5  ;;  %v2630_v9 = vld [vmem:[%s3033_s0 + $0xb8] sm:$0xff] }
 0x16e   :  { %v1883_v18 = vpop.eup %1882  ;;  %v575_v19 = vadd.f32 1.0, %v1881_v14  ;;  %v417_v20 = vmax.f32 %v343_v12, 0.0 }
 0x16f   :  { %1892 = vpow2.f32 %v541_v15  ;;  %v483_v21 = vsub.f32 0.0, %v451_v16  ;;  %v418_v22 = vmax.f32 %v345_v17, 0.0  ;;  %v348_v23 = vpop.f32.mrb[60].mxu0  ;;  %v2611_v24 = vmul.f32 %v2608_v6, %v1883_v18 }
 0x170   :  { %1894 = vrcp.f32 %v575_v19  ;;  %v349_v25 = vadd.f32 %v348_v23, %v2457_v47  ;;  %v350_v26 = vpop.f32.mrb[61].mxu0  ;;  %v2645_v19 = vld [vmem:[%s3033_s0 + $0xc0] sm:$0xff] }
 0x171   :  { %v1885_v27 = vpop.eup %1884  ;;  %v543_v28 = vmul.f32 1.442695, %v483_v21  ;;  %v452_v29 = vadd.f32 %v418_v22, %v417_v20  ;;  %v351_v30 = vadd.f32 %v350_v26, %v2459_v48  ;;  %1596 = vmatmul.mubr.f32.gmra.mrb[20].mxu1 %v2611_v24  ;;  %v1153_v21 = vld [vmem:[%s3036_s5 + $0x10] sm:$0xff]  ;;  %v1154_v22 = vld [vmem:[%s3036_s5 + $0x18] sm:$0xff] }
 0x172   :  { %v1887_v31 = vpop.eup %1886  ;;  %v576_v32 = vadd.f32 1.0, %v1885_v27  ;;  %v419_v33 = vmax.f32 %v349_v25, 0.0  ;;  %v1761_v26 = vpack.c.bf16 %v1154_v22, %v1153_v21 }
 0x173   :  { %1896 = vpow2.f32 %v543_v28  ;;  %v484_v34 = vsub.f32 0.0, %v452_v29  ;;  %v420_v35 = vmax.f32 %v351_v30, 0.0  ;;  %v354_v36 = vpop.f32.mrb[62].mxu0  ;;  %v2622_v38 = vmul.f32 %v2619_v37, %v1887_v31  ;;  %v2660_v29 = vld [vmem:[%s3033_s0 + $0xc8] sm:$0xff]  ;;  %v1155_v31 = vld [vmem:[%s3036_s5 + $0x20] sm:$0xff] }
 0x174   :  { %1898 = vrcp.f32 %v576_v32  ;;  %v355_v39 = vadd.f32 %v354_v36, %v2457_v47  ;;  %v356_v40 = vpop.f32.mrb[63].mxu0  ;;  %v1156_v32 = vld [vmem:[%s3036_s5 + $0x28] sm:$0xff] }
 0x175   :  { %v1889_v41 = vpop.eup %1888  ;;  %v545_v42 = vmul.f32 1.442695, %v484_v34  ;;  %v453_v43 = vadd.f32 %v420_v35, %v419_v33  ;;  %v357_v44 = vadd.f32 %v356_v40, %v2459_v48  ;;  %1598 = vmatprep.mubr.f32.mxu1 %v2622_v38  ;;  %v1151_v48 = vld [vmem:[%s3036_s5] sm:$0xff]  ;;  %v1765_v34 = vpack.c.bf16 %v1156_v32, %v1155_v31  ;;  %v2735_v32 = vld [vmem:[%s3033_s0 + $0xf0] sm:$0xff] }
 0x176   :  { %v1891_v45 = vpop.eup %1890  ;;  %v577_v46 = vadd.f32 1.0, %v1889_v41  ;;  %v421_v3 = vmax.f32 %v355_v39, 0.0  ;;  %v1757_v15 = vpack.c.bf16 %v1152_v10, %v1151_v48  ;;  %v2675_v39 = vld [vmem:[%s3033_s0 + $0xd0] sm:$0xff]  ;;  %v1160_v48 = vld [vmem:[%s3036_s5 + $0x48] sm:$0xff] }
 0x177   :  { %1900 = vpow2.f32 %v545_v42  ;;  %v485_v7 = vsub.f32 0.0, %v453_v43  ;;  %v422_v8 = vmax.f32 %v357_v44, 0.0  ;;  %v2633_v47 = vmul.f32 %v2630_v9, %v1891_v45  ;;  %v1157_v41 = vld [vmem:[%s3036_s5 + $0x30] sm:$0xff]  ;;  %v1158_v42 = vld [vmem:[%s3036_s5 + $0x38] sm:$0xff] }
 0x178   :  { %1902 = vrcp.f32 %v577_v46  ;;  %1758 = vmatprep.subr.bf16.mxu1 %v1757_v15  ;;  %v1769_v44 = vpack.c.bf16 %v1158_v42, %v1157_v41  ;;  %v2750_v42 = vld [vmem:[%s3033_s0 + $0xf8] sm:$0xff] }
 0x179   :  { %v1893_v12 = vpop.eup %1892  ;;  %v547_v13 = vmul.f32 1.442695, %v485_v7  ;;  %v454_v14 = vadd.f32 %v422_v8, %v421_v3  ;;  %1599 = vmatmul.mubr.f32.gmra.mrb[22].mxu1 %v2633_v47  ;;  %v2690_v3 = vld [vmem:[%s3033_s0 + $0xd8] sm:$0xff]  ;;  %v1159_v8 = vld [vmem:[%s3036_s5 + $0x40] sm:$0xff] }
 0x17a   :  { %v1895_v16 = vpop.eup %1894  ;;  %v578_v17 = vadd.f32 1.0, %v1893_v12  ;;  %1760 = vmatpush3.bf16.msra.mxu1 %v1757_v15  ;;  %v1773_v12 = vpack.c.bf16 %v1160_v48, %v1159_v8  ;;  %v2705_v15 = vld [vmem:[%s3033_s0 + $0xe0] sm:$0xff] }
 0x17b   :  { %1904 = vpow2.f32 %v547_v13  ;;  %v486_v18 = vsub.f32 0.0, %v454_v14  ;;  %v2648_v20 = vmul.f32 %v2645_v19, %v1895_v16  ;;  %1762 = vmatprep.subr.bf16.mxu1 %v1761_v26 }
 0x17c   :  { %1906 = vrcp.f32 %v578_v17  ;;  %v1161_v17 = vld [vmem:[%s3036_s5 + $0x50] sm:$0xff] }
 0x17d   :  { %v1897_v23 = vpop.eup %1896  ;;  %v549_v25 = vmul.f32 1.442695, %v486_v18  ;;  %1601 = vmatprep.mubr.f32.mxu1 %v2648_v20  ;;  %v1162_v18 = vld [vmem:[%s3036_s5 + $0x58] sm:$0xff] }
 0x17e   :  { %v1899_v27 = vpop.eup %1898  ;;  %v579_v28 = vadd.f32 1.0, %v1897_v23  ;;  %1764 = vmatpush3.bf16.msra.mxu1 %v1761_v26  ;;  %v1777_v21 = vpack.c.bf16 %v1162_v18, %v1161_v17  ;;  %v2720_v23 = vld [vmem:[%s3033_s0 + $0xe8] sm:$0xff]  ;;  %v1163_v26 = vld [vmem:[%s3036_s5 + $0x60] sm:$0xff] }
 0x17f   :  { %1908 = vpow2.f32 %v549_v25  ;;  %v2663_v30 = vmul.f32 %v2660_v29, %v1899_v27  ;;  %1766 = vmatprep.subr.bf16.mxu1 %v1765_v34  ;;  %v1164_v27 = vld [vmem:[%s3036_s5 + $0x68] sm:$0xff] }
 0x180   :  { %1910 = vrcp.f32 %v579_v28  ;;  %v1781_v28 = vpack.c.bf16 %v1164_v27, %v1163_v26 }
 0x181   :  { %v1901_v33 = vpop.eup %1900  ;;  %1602 = vmatmul.mubr.f32.gmra.mrb[24].mxu1 %v2663_v30 }
 0x182   :  { %v1903_v35 = vpop.eup %1902  ;;  %v580_v36 = vadd.f32 1.0, %v1901_v33  ;;  %1768 = vmatpush3.bf16.msra.mxu1 %v1765_v34  ;;  %v1165_v34 = vld [vmem:[%s3036_s5 + $0x70] sm:$0xff] }
 0x183   :  { %v2678_v40 = vmul.f32 %v2675_v39, %v1903_v35  ;;  %1770 = vmatprep.subr.bf16.mxu1 %v1769_v44  ;;  %v1166_v35 = vld [vmem:[%s3036_s5 + $0x78] sm:$0xff] }
 0x184   :  { %1912 = vrcp.f32 %v580_v36  ;;  %v1785_v36 = vpack.c.bf16 %v1166_v35, %v1165_v34 }
 0x185   :  { %v1905_v43 = vpop.eup %1904  ;;  %1604 = vmatprep.mubr.f32.mxu1 %v2678_v40 }
 0x186   :  { %v1907_v45 = vpop.eup %1906  ;;  %v581_v46 = vadd.f32 1.0, %v1905_v43  ;;  %1772 = vmatpush3.bf16.msra.mxu1 %v1769_v44  ;;  %v2759_v44 = vld [vmem:[%s3037_s4] ss:$0 sm:$0xff] }
 0x187   :  { %v2693_v7 = vmul.f32 %v2690_v3, %v1907_v45  ;;  %1774 = vmatprep.subr.bf16.mxu1 %v1773_v12 }
 0x188   :  { %1914 = vrcp.f32 %v581_v46 }
 0x189   :  { %v1909_v10 = vpop.eup %1908  ;;  %1605 = vmatmul.mubr.f32.gmra.mrb[26].mxu1 %v2693_v7 }
 0x18a   :  { %v1911_v13 = vpop.eup %1910  ;;  %v582_v14 = vadd.f32 1.0, %v1909_v10  ;;  %1776 = vmatpush3.bf16.msra.mxu1 %v1773_v12 }
 0x18b   :  { %v2708_v16 = vmul.f32 %v2705_v15, %v1911_v13  ;;  %1778 = vmatprep.subr.bf16.mxu1 %v1777_v21 }
 0x18c   :  { %1916 = vrcp.f32 %v582_v14 }
 0x18d   :  { %1607 = vmatprep.mubr.f32.mxu1 %v2708_v16 }
 0x18e   :  { %v1913_v22 = vpop.eup %1912  ;;  %1780 = vmatpush3.bf16.msra.mxu1 %v1777_v21 }
 0x18f   :  { %v2723_v25 = vmul.f32 %v2720_v23, %v1913_v22  ;;  %1782 = vmatprep.subr.bf16.mxu1 %v1781_v28 }
 0x191   :  { %1608 = vmatmul.mubr.f32.gmra.mrb[28].mxu1 %v2723_v25 }
 0x192   :  { %v1915_v31 = vpop.eup %1914  ;;  %1784 = vmatpush3.bf16.msra.mxu1 %v1781_v28 }
 0x193   :  { %v2738_v33 = vmul.f32 %v2735_v32, %v1915_v31  ;;  %1786 = vmatprep.subr.bf16.mxu1 %v1785_v36 }
 0x195   :  { %1610 = vmatprep.mubr.f32.mxu1 %v2738_v33 }
 0x196   :  { %v1917_v41 = vpop.eup %1916  ;;  %1788 = vmatpush3.bf16.msra.mxu1 %v1785_v36 }
 0x197   :  { %v2753_v43 = vmul.f32 %v2750_v42, %v1917_v41 }
 0x199   :  { %1611 = vmatmul.mubr.f32.gmra.mrb[30].mxu1 %v2753_v43 }
 0x1f4   :  { %v1567_v45 = vpop.f32.mrb[0].mxu1 }
 0x1f5   :  { %v742_v46 = vadd.f32 %v1567_v45, %v2759_v44  ;;  %v736_v8 = vpop.f32.mrb[1].mxu1 }
 0x1f6   :  { %v737_v48 = vadd.f32 %v2759_v44, %v736_v8 }
 0x1f7   :  { %v896_v10 = vmax.f32 %v742_v46, 0.0 }
 0x1f8   :  { %v895_v12 = vmax.f32 %v737_v48, 0.0 }
 0x1f9   :  { %v928_v13 = vsub.f32 0.0, %v896_v10 }
 0x1fa   :  { %v927_v14 = vsub.f32 0.0, %v895_v12 }
 0x1fb   :  { %v961_v17 = vmul.f32 1.442695, %v928_v13 }
 0x1fc   :  { %v959_v18 = vmul.f32 1.442695, %v927_v14  ;;  %v1570_v21 = vpop.f32.mrb[2].mxu1 }
 0x1fd   :  { %1918 = vpow2.f32 %v961_v17  ;;  %v752_v22 = vadd.f32 %v1570_v21, %v2759_v44  ;;  %v746_v26 = vpop.f32.mrb[3].mxu1 }
 0x1fe   :  { %1920 = vpow2.f32 %v959_v18  ;;  %v747_v27 = vadd.f32 %v2759_v44, %v746_v26 }
 0x1ff   :  { %v898_v28 = vmax.f32 %v752_v22, 0.0 }
 0x200   :  { %v897_v31 = vmax.f32 %v747_v27, 0.0 }
 0x201   :  { %v930_v34 = vsub.f32 0.0, %v898_v28 }
 0x202   :  { %v929_v35 = vsub.f32 0.0, %v897_v31 }
 0x203   :  { %v965_v36 = vmul.f32 1.442695, %v930_v34 }
 0x204   :  { %v963_v41 = vmul.f32 1.442695, %v929_v35  ;;  %v1573_v45 = vpop.f32.mrb[4].mxu1 }
 0x205   :  { %1922 = vpow2.f32 %v965_v36  ;;  %v762_v46 = vadd.f32 %v1573_v45, %v2759_v44  ;;  %v756_v8 = vpop.f32.mrb[5].mxu1 }
 0x206   :  { %1924 = vpow2.f32 %v963_v41  ;;  %v757_v48 = vadd.f32 %v2759_v44, %v756_v8 }
 0x207   :  { %v1919_v10 = vpop.eup %1918  ;;  %v900_v12 = vmax.f32 %v762_v46, 0.0 }
 0x208   :  { %v1921_v13 = vpop.eup %1920  ;;  %v1024_v14 = vadd.f32 1.0, %v1919_v10  ;;  %v899_v17 = vmax.f32 %v757_v48, 0.0 }
 0x209   :  { %v1023_v18 = vadd.f32 1.0, %v1921_v13  ;;  %v932_v21 = vsub.f32 0.0, %v900_v12 }
 0x20a   :  { %1926 = vrcp.f32 %v1024_v14  ;;  %v931_v22 = vsub.f32 0.0, %v899_v17 }
 0x20b   :  { %1928 = vrcp.f32 %v1023_v18  ;;  %v969_v26 = vmul.f32 1.442695, %v932_v21 }
 0x20c   :  { %v967_v27 = vmul.f32 1.442695, %v931_v22  ;;  %v1576_v28 = vpop.f32.mrb[6].mxu1 }
 0x20d   :  { %1930 = vpow2.f32 %v969_v26  ;;  %v772_v31 = vadd.f32 %v1576_v28, %v2759_v44  ;;  %v766_v34 = vpop.f32.mrb[7].mxu1 }
 0x20e   :  { %1932 = vpow2.f32 %v967_v27  ;;  %v767_v35 = vadd.f32 %v2759_v44, %v766_v34 }
 0x20f   :  { %v1923_v36 = vpop.eup %1922  ;;  %v902_v41 = vmax.f32 %v772_v31, 0.0 }
 0x210   :  { %v1925_v45 = vpop.eup %1924  ;;  %v1026_v46 = vadd.f32 1.0, %v1923_v36  ;;  %v901_v8 = vmax.f32 %v767_v35, 0.0 }
 0x211   :  { %v1025_v48 = vadd.f32 1.0, %v1925_v45  ;;  %v934_v10 = vsub.f32 0.0, %v902_v41 }
 0x212   :  { %1934 = vrcp.f32 %v1026_v46  ;;  %v933_v12 = vsub.f32 0.0, %v901_v8  ;;  %v2057_v46 = vld [vmem:[%s3033_s0] sm:$0xff] }
 0x213   :  { %1936 = vrcp.f32 %v1025_v48  ;;  %v973_v13 = vmul.f32 1.442695, %v934_v10 }
 0x214   :  { %v1927_v14 = vpop.eup %1926  ;;  %v971_v17 = vmul.f32 1.442695, %v933_v12  ;;  %v1579_v18 = vpop.f32.mrb[8].mxu1 }
 0x215   :  { %v1929_v21 = vpop.eup %1928  ;;  %1938 = vpow2.f32 %v973_v13  ;;  %v782_v22 = vadd.f32 %v1579_v18, %v2759_v44  ;;  %v776_v26 = vpop.f32.mrb[9].mxu1  ;;  %v1088_v27 = vmul.f32 %v1927_v14, %v2486_v49  ;;  %v2058_v49 = vld [vmem:[%s3033_s0 + $0x8] sm:$0xff] }
 0x216   :  { %1940 = vpow2.f32 %v971_v17  ;;  %v777_v28 = vadd.f32 %v2759_v44, %v776_v26  ;;  %v1087_v31 = vmul.f32 %v1929_v21, %v2480_v11 }
 0x217   :  { %v1931_v34 = vpop.eup %1930  ;;  %v904_v35 = vmax.f32 %v782_v22, 0.0  ;;  %v1120_v12 = vadd.f32 %v2058_v49, %v1088_v27 }
 0x218   :  { %v1933_v36 = vpop.eup %1932  ;;  %v1028_v41 = vadd.f32 1.0, %v1931_v34  ;;  %v903_v45 = vmax.f32 %v777_v28, 0.0  ;;  %v1119_v8 = vadd.f32 %v2057_v46, %v1087_v31  ;;  %v2059_v46 = vld [vmem:[%s3033_s0 + $0x10] sm:$0xff] }
 0x219   :  { %v1027_v48 = vadd.f32 1.0, %v1933_v36  ;;  %v936_v10 = vsub.f32 0.0, %v904_v35 }
 0x21a   :  { %1942 = vrcp.f32 %v1028_v41  ;;  %v935_v13 = vsub.f32 0.0, %v903_v45  ;;  %1645 = vmatprep.mubr.f32.mxu1 %v1119_v8 }
 0x21b   :  { %1944 = vrcp.f32 %v1027_v48  ;;  %v977_v11 = vmul.f32 1.442695, %v936_v10  ;;  %1646 = vmatmul.mubr.f32.vlgmr.msra.gmra.mrb[32].mxu1 %v1120_v12 }
 0x21c   :  { %v1935_v14 = vpop.eup %1934  ;;  %v975_v17 = vmul.f32 1.442695, %v935_v13  ;;  %v1582_v18 = vpop.f32.mrb[10].mxu1 }
 0x21d   :  { %v1937_v21 = vpop.eup %1936  ;;  %1946 = vpow2.f32 %v977_v11  ;;  %v792_v22 = vadd.f32 %v1582_v18, %v2759_v44  ;;  %v786_v26 = vpop.f32.mrb[11].mxu1  ;;  %v1090_v28 = vmul.f32 %v1935_v14, %v2498_v51  ;;  %v2060_v51 = vld [vmem:[%s3033_s0 + $0x18] sm:$0xff] }
 0x21e   :  { %1948 = vpow2.f32 %v975_v17  ;;  %v787_v31 = vadd.f32 %v2759_v44, %v786_v26  ;;  %v1089_v27 = vmul.f32 %v1937_v21, %v2492_v50 }
 0x21f   :  { %v1939_v34 = vpop.eup %1938  ;;  %v906_v35 = vmax.f32 %v792_v22, 0.0  ;;  %v1122_v49 = vadd.f32 %v2060_v51, %v1090_v28 }
 0x220   :  { %v1941_v36 = vpop.eup %1940  ;;  %v1030_v41 = vadd.f32 1.0, %v1939_v34  ;;  %v905_v45 = vmax.f32 %v787_v31, 0.0  ;;  %v1121_v8 = vadd.f32 %v2059_v46, %v1089_v27 }
 0x221   :  { %v1029_v48 = vadd.f32 1.0, %v1941_v36  ;;  %v938_v10 = vsub.f32 0.0, %v906_v35 }
 0x222   :  { %1950 = vrcp.f32 %v1030_v41  ;;  %v937_v12 = vsub.f32 0.0, %v905_v45  ;;  %1648 = vmatprep.mubr.f32.mxu1 %v1121_v8  ;;  %v2061_v41 = vld [vmem:[%s3033_s0 + $0x20] sm:$0xff] }
 0x223   :  { %1952 = vrcp.f32 %v1029_v48  ;;  %v981_v50 = vmul.f32 1.442695, %v938_v10  ;;  %1649 = vmatmul.mubr.f32.gmra.mrb[34].mxu1 %v1122_v49 }
 0x224   :  { %v1943_v13 = vpop.eup %1942  ;;  %v979_v11 = vmul.f32 1.442695, %v937_v12  ;;  %v1585_v14 = vpop.f32.mrb[12].mxu1 }
 0x225   :  { %v1945_v17 = vpop.eup %1944  ;;  %1954 = vpow2.f32 %v981_v50  ;;  %v802_v18 = vadd.f32 %v1585_v14, %v2759_v44  ;;  %v796_v21 = vpop.f32.mrb[13].mxu1  ;;  %v1092_v22 = vmul.f32 %v1943_v13, %v2510_v53  ;;  %v2062_v53 = vld [vmem:[%s3033_s0 + $0x28] sm:$0xff] }
 0x226   :  { %1956 = vpow2.f32 %v979_v11  ;;  %v797_v26 = vadd.f32 %v2759_v44, %v796_v21  ;;  %v1091_v28 = vmul.f32 %v1945_v17, %v2504_v52 }
 0x227   :  { %v1947_v31 = vpop.eup %1946  ;;  %v908_v27 = vmax.f32 %v802_v18, 0.0  ;;  %v1124_v48 = vadd.f32 %v2062_v53, %v1092_v22 }
 0x228   :  { %v1949_v34 = vpop.eup %1948  ;;  %v1032_v35 = vadd.f32 1.0, %v1947_v31  ;;  %v907_v36 = vmax.f32 %v797_v26, 0.0  ;;  %v1123_v45 = vadd.f32 %v2061_v41, %v1091_v28 }
 0x229   :  { %v1031_v46 = vadd.f32 1.0, %v1949_v34  ;;  %v940_v8 = vsub.f32 0.0, %v908_v27  ;;  %v2063_v27 = vld [vmem:[%s3033_s0 + $0x30] sm:$0xff] }
 0x22a   :  { %1958 = vrcp.f32 %v1032_v35  ;;  %v939_v10 = vsub.f32 0.0, %v907_v36  ;;  %1651 = vmatprep.mubr.f32.mxu1 %v1123_v45 }
 0x22b   :  { %1960 = vrcp.f32 %v1031_v46  ;;  %v985_v52 = vmul.f32 1.442695, %v940_v8  ;;  %1652 = vmatmul.mubr.f32.gmra.mrb[36].mxu1 %v1124_v48 }
 0x22c   :  { %v1951_v51 = vpop.eup %1950  ;;  %v983_v49 = vmul.f32 1.442695, %v939_v10  ;;  %v1588_v12 = vpop.f32.mrb[14].mxu1 }
 0x22d   :  { %v1953_v50 = vpop.eup %1952  ;;  %1962 = vpow2.f32 %v985_v52  ;;  %v812_v13 = vadd.f32 %v1588_v12, %v2759_v44  ;;  %v806_v11 = vpop.f32.mrb[15].mxu1  ;;  %v1094_v14 = vmul.f32 %v1951_v51, %v2522_v55  ;;  %v2064_v55 = vld [vmem:[%s3033_s0 + $0x38] sm:$0xff] }
 0x22e   :  { %1964 = vpow2.f32 %v983_v49  ;;  %v807_v17 = vadd.f32 %v2759_v44, %v806_v11  ;;  %v1093_v18 = vmul.f32 %v1953_v50, %v2516_v54 }
 0x22f   :  { %v1955_v21 = vpop.eup %1954  ;;  %v910_v22 = vmax.f32 %v812_v13, 0.0  ;;  %v1126_v41 = vadd.f32 %v2064_v55, %v1094_v14 }
 0x230   :  { %v1957_v26 = vpop.eup %1956  ;;  %v1034_v28 = vadd.f32 1.0, %v1955_v21  ;;  %v909_v31 = vmax.f32 %v807_v17, 0.0  ;;  %v1125_v34 = vadd.f32 %v2063_v27, %v1093_v18  ;;  %v2065_v18 = vld [vmem:[%s3033_s0 + $0x40] sm:$0xff] }
 0x231   :  { %v1033_v35 = vadd.f32 1.0, %v1957_v26  ;;  %v942_v36 = vsub.f32 0.0, %v910_v22 }
 0x232   :  { %1966 = vrcp.f32 %v1034_v28  ;;  %v941_v45 = vsub.f32 0.0, %v909_v31  ;;  %1654 = vmatprep.mubr.f32.mxu1 %v1125_v34 }
 0x233   :  { %1968 = vrcp.f32 %v1033_v35  ;;  %v989_v54 = vmul.f32 1.442695, %v942_v36  ;;  %1655 = vmatmul.mubr.f32.gmra.mrb[38].mxu1 %v1126_v41 }
 0x234   :  { %v1959_v46 = vpop.eup %1958  ;;  %v987_v8 = vmul.f32 1.442695, %v941_v45  ;;  %v1591_v53 = vpop.f32.mrb[16].mxu1 }
 0x235   :  { %v1961_v48 = vpop.eup %1960  ;;  %1970 = vpow2.f32 %v989_v54  ;;  %v822_v10 = vadd.f32 %v1591_v53, %v2759_v44  ;;  %v816_v52 = vpop.f32.mrb[17].mxu1  ;;  %v1096_v51 = vmul.f32 %v1959_v46, %v2534_v57  ;;  %v2066_v57 = vld [vmem:[%s3033_s0 + $0x48] sm:$0xff] }
 0x236   :  { %1972 = vpow2.f32 %v987_v8  ;;  %v817_v49 = vadd.f32 %v2759_v44, %v816_v52  ;;  %v1095_v12 = vmul.f32 %v1961_v48, %v2528_v56 }
 0x237   :  { %v1963_v50 = vpop.eup %1962  ;;  %v912_v13 = vmax.f32 %v822_v10, 0.0  ;;  %v1128_v28 = vadd.f32 %v2066_v57, %v1096_v51  ;;  %v2067_v51 = vld [vmem:[%s3033_s0 + $0x50] sm:$0xff] }
 0x238   :  { %v1965_v11 = vpop.eup %1964  ;;  %v1036_v14 = vadd.f32 1.0, %v1963_v50  ;;  %v911_v17 = vmax.f32 %v817_v49, 0.0  ;;  %v1127_v21 = vadd.f32 %v2065_v18, %v1095_v12 }
 0x239   :  { %v1035_v22 = vadd.f32 1.0, %v1965_v11  ;;  %v944_v26 = vsub.f32 0.0, %v912_v13 }
 0x23a   :  { %1974 = vrcp.f32 %v1036_v14  ;;  %v943_v31 = vsub.f32 0.0, %v911_v17  ;;  %1657 = vmatprep.mubr.f32.mxu1 %v1127_v21 }
 0x23b   :  { %1976 = vrcp.f32 %v1035_v22  ;;  %v993_v56 = vmul.f32 1.442695, %v944_v26  ;;  %1658 = vmatmul.mubr.f32.gmra.mrb[40].mxu1 %v1128_v28 }
 0x23c   :  { %v1967_v27 = vpop.eup %1966  ;;  %v991_v34 = vmul.f32 1.442695, %v943_v31  ;;  %v1594_v35 = vpop.f32.mrb[18].mxu1 }
 0x23d   :  { %v1969_v36 = vpop.eup %1968  ;;  %1978 = vpow2.f32 %v993_v56  ;;  %v832_v55 = vadd.f32 %v1594_v35, %v2759_v44  ;;  %v826_v41 = vpop.f32.mrb[19].mxu1  ;;  %v1098_v45 = vmul.f32 %v1967_v27, %v2546_v59  ;;  %v2068_v59 = vld [vmem:[%s3033_s0 + $0x58] sm:$0xff] }
 0x23e   :  { %1980 = vpow2.f32 %v991_v34  ;;  %v827_v54 = vadd.f32 %v2759_v44, %v826_v41  ;;  %v1097_v46 = vmul.f32 %v1969_v36, %v2540_v58 }
 0x23f   :  { %v1971_v8 = vpop.eup %1970  ;;  %v914_v53 = vmax.f32 %v832_v55, 0.0  ;;  %v1130_v13 = vadd.f32 %v2068_v59, %v1098_v45  ;;  %v2069_v55 = vld [vmem:[%s3033_s0 + $0x60] sm:$0xff] }
 0x240   :  { %v1973_v48 = vpop.eup %1972  ;;  %v1038_v10 = vadd.f32 1.0, %v1971_v8  ;;  %v913_v52 = vmax.f32 %v827_v54, 0.0  ;;  %v1129_v49 = vadd.f32 %v2067_v51, %v1097_v46 }
 0x241   :  { %v1037_v12 = vadd.f32 1.0, %v1973_v48  ;;  %v946_v50 = vsub.f32 0.0, %v914_v53 }
 0x242   :  { %1982 = vrcp.f32 %v1038_v10  ;;  %v945_v11 = vsub.f32 0.0, %v913_v52  ;;  %1660 = vmatprep.mubr.f32.mxu1 %v1129_v49 }
 0x243   :  { %1984 = vrcp.f32 %v1037_v12  ;;  %v997_v58 = vmul.f32 1.442695, %v946_v50  ;;  %1661 = vmatmul.mubr.f32.gmra.mrb[42].mxu1 %v1130_v13 }
 0x244   :  { %v1975_v14 = vpop.eup %1974  ;;  %v995_v17 = vmul.f32 1.442695, %v945_v11  ;;  %v1597_v18 = vpop.f32.mrb[20].mxu1 }
 0x245   :  { %v1977_v21 = vpop.eup %1976  ;;  %1986 = vpow2.f32 %v997_v58  ;;  %v842_v22 = vadd.f32 %v1597_v18, %v2759_v44  ;;  %v836_v26 = vpop.f32.mrb[21].mxu1  ;;  %v1100_v57 = vmul.f32 %v1975_v14, %v2558_v61  ;;  %v2070_v61 = vld [vmem:[%s3033_s0 + $0x68] sm:$0xff]  ;;  %v2071_v18 = vld [vmem:[%s3033_s0 + $0x70] sm:$0xff] }
 0x246   :  { %1988 = vpow2.f32 %v995_v17  ;;  %v837_v28 = vadd.f32 %v2759_v44, %v836_v26  ;;  %v1099_v31 = vmul.f32 %v1977_v21, %v2552_v60 }
 0x247   :  { %v1979_v56 = vpop.eup %1978  ;;  %v916_v27 = vmax.f32 %v842_v22, 0.0  ;;  %v1132_v46 = vadd.f32 %v2070_v61, %v1100_v57 }
 0x248   :  { %v1981_v34 = vpop.eup %1980  ;;  %v1040_v35 = vadd.f32 1.0, %v1979_v56  ;;  %v915_v36 = vmax.f32 %v837_v28, 0.0  ;;  %v1131_v41 = vadd.f32 %v2069_v55, %v1099_v31 }
 0x249   :  { %v1039_v45 = vadd.f32 1.0, %v1981_v34  ;;  %v948_v54 = vsub.f32 0.0, %v916_v27 }
 0x24a   :  { %1990 = vrcp.f32 %v1040_v35  ;;  %v947_v8 = vsub.f32 0.0, %v915_v36  ;;  %1663 = vmatprep.mubr.f32.mxu1 %v1131_v41 }
 0x24b   :  { %1992 = vrcp.f32 %v1039_v45  ;;  %v1001_v60 = vmul.f32 1.442695, %v948_v54  ;;  %1664 = vmatmul.mubr.f32.gmra.mrb[44].mxu1 %v1132_v46 }
 0x24c   :  { %v1983_v53 = vpop.eup %1982  ;;  %v999_v48 = vmul.f32 1.442695, %v947_v8  ;;  %v1600_v10 = vpop.f32.mrb[22].mxu1 }
 0x24d   :  { %v1985_v52 = vpop.eup %1984  ;;  %1994 = vpow2.f32 %v1001_v60  ;;  %v852_v51 = vadd.f32 %v1600_v10, %v2759_v44  ;;  %v846_v49 = vpop.f32.mrb[23].mxu1  ;;  %v1102_v12 = vmul.f32 %v1983_v53, %v2570_v63  ;;  %v2072_v63 = vld [vmem:[%s3033_s0 + $0x78] sm:$0xff]  ;;  %v2073_v53 = vld [vmem:[%s3033_s0 + $0x80] sm:$0xff] }
 0x24e   :  { %1996 = vpow2.f32 %v999_v48  ;;  %v847_v50 = vadd.f32 %v2759_v44, %v846_v49  ;;  %v1101_v59 = vmul.f32 %v1985_v52, %v2564_v62 }
 0x24f   :  { %v1987_v13 = vpop.eup %1986  ;;  %v918_v11 = vmax.f32 %v852_v51, 0.0  ;;  %v1134_v57 = vadd.f32 %v2072_v63, %v1102_v12 }
 0x250   :  { %v1989_v58 = vpop.eup %1988  ;;  %v1042_v14 = vadd.f32 1.0, %v1987_v13  ;;  %v917_v17 = vmax.f32 %v847_v50, 0.0  ;;  %v1133_v21 = vadd.f32 %v2071_v18, %v1101_v59 }
 0x251   :  { %v1041_v22 = vadd.f32 1.0, %v1989_v58  ;;  %v950_v26 = vsub.f32 0.0, %v918_v11 }
 0x252   :  { %1998 = vrcp.f32 %v1042_v14  ;;  %v949_v28 = vsub.f32 0.0, %v917_v17  ;;  %1666 = vmatprep.mubr.f32.mxu1 %v1133_v21 }
 0x253   :  { %2000 = vrcp.f32 %v1041_v22  ;;  %v1005_v62 = vmul.f32 1.442695, %v950_v26  ;;  %1667 = vmatmul.mubr.f32.gmra.mrb[46].mxu1 %v1134_v57 }
 0x254   :  { %v1991_v31 = vpop.eup %1990  ;;  %v1003_v56 = vmul.f32 1.442695, %v949_v28  ;;  %v1603_v27 = vpop.f32.mrb[24].mxu1  ;;  %v2075_v28 = vld [vmem:[%s3033_s0 + $0x90] sm:$0xff] }
 0x255   :  { %v1993_v34 = vpop.eup %1992  ;;  %2002 = vpow2.f32 %v1005_v62  ;;  %v862_v35 = vadd.f32 %v1603_v27, %v2759_v44  ;;  %v856_v36 = vpop.f32.mrb[25].mxu1  ;;  %v1104_v55 = vmul.f32 %v1991_v31, %v2582_v1  ;;  %v2074_v1 = vld [vmem:[%s3033_s0 + $0x88] sm:$0xff] }
 0x256   :  { %2004 = vpow2.f32 %v1003_v56  ;;  %v857_v41 = vadd.f32 %v2759_v44, %v856_v36  ;;  %v1103_v45 = vmul.f32 %v1993_v34, %v2576_v0 }
 0x257   :  { %v1995_v54 = vpop.eup %1994  ;;  %v920_v61 = vmax.f32 %v862_v35, 0.0  ;;  %v1136_v51 = vadd.f32 %v2074_v1, %v1104_v55  ;;  %v2077_v1 = vld [vmem:[%s3033_s0 + $0xa0] sm:$0xff] }
 0x258   :  { %v1997_v46 = vpop.eup %1996  ;;  %v1044_v8 = vadd.f32 1.0, %v1995_v54  ;;  %v919_v60 = vmax.f32 %v857_v41, 0.0  ;;  %v1135_v48 = vadd.f32 %v2073_v53, %v1103_v45 }
 0x259   :  { %v1043_v10 = vadd.f32 1.0, %v1997_v46  ;;  %v952_v52 = vsub.f32 0.0, %v920_v61 }
 0x25a   :  { %2006 = vrcp.f32 %v1044_v8  ;;  %v951_v49 = vsub.f32 0.0, %v919_v60  ;;  %1669 = vmatprep.mubr.f32.mxu1 %v1135_v48 }
 0x25b   :  { %2008 = vrcp.f32 %v1043_v10  ;;  %v1009_v0 = vmul.f32 1.442695, %v952_v52  ;;  %1670 = vmatmul.mubr.f32.gmra.mrb[48].mxu1 %v1136_v51 }
 0x25c   :  { %v1999_v12 = vpop.eup %1998  ;;  %v1007_v50 = vmul.f32 1.442695, %v951_v49  ;;  %v1606_v59 = vpop.f32.mrb[26].mxu1 }
 0x25d   :  { %v2001_v13 = vpop.eup %2000  ;;  %2010 = vpow2.f32 %v1009_v0  ;;  %v872_v11 = vadd.f32 %v1606_v59, %v2759_v44  ;;  %v866_v58 = vpop.f32.mrb[27].mxu1  ;;  %v1106_v14 = vmul.f32 %v1999_v12, %v2594_v4  ;;  %v2076_v4 = vld [vmem:[%s3033_s0 + $0x98] sm:$0xff] }
 0x25e   :  { %2012 = vpow2.f32 %v1007_v50  ;;  %v867_v17 = vadd.f32 %v2759_v44, %v866_v58  ;;  %v1105_v18 = vmul.f32 %v2001_v13, %v2588_v2 }
 0x25f   :  { %v2003_v21 = vpop.eup %2002  ;;  %v922_v22 = vmax.f32 %v872_v11, 0.0  ;;  %v1138_v27 = vadd.f32 %v2076_v4, %v1106_v14 }
 0x260   :  { %v2005_v26 = vpop.eup %2004  ;;  %v1046_v63 = vadd.f32 1.0, %v2003_v21  ;;  %v921_v57 = vmax.f32 %v867_v17, 0.0  ;;  %v1137_v62 = vadd.f32 %v2075_v28, %v1105_v18 }
 0x261   :  { %v1045_v31 = vadd.f32 1.0, %v2005_v26  ;;  %v954_v56 = vsub.f32 0.0, %v922_v22 }
 0x262   :  { %2014 = vrcp.f32 %v1046_v63  ;;  %v953_v34 = vsub.f32 0.0, %v921_v57  ;;  %1672 = vmatprep.mubr.f32.mxu1 %v1137_v62 }
 0x263   :  { %2016 = vrcp.f32 %v1045_v31  ;;  %v1013_v2 = vmul.f32 1.442695, %v954_v56  ;;  %1673 = vmatmul.mubr.f32.gmra.mrb[50].mxu1 %v1138_v27 }
 0x264   :  { %v2007_v35 = vpop.eup %2006  ;;  %v1011_v36 = vmul.f32 1.442695, %v953_v34  ;;  %v1609_v55 = vpop.f32.mrb[28].mxu1 }
 0x265   :  { %v2009_v41 = vpop.eup %2008  ;;  %2018 = vpow2.f32 %v1013_v2  ;;  %v882_v45 = vadd.f32 %v1609_v55, %v2759_v44  ;;  %v876_v54 = vpop.f32.mrb[29].mxu1  ;;  %v1108_v61 = vmul.f32 %v2007_v35, %v2611_v24 }
 0x266   :  { %2020 = vpow2.f32 %v1011_v36  ;;  %v877_v46 = vadd.f32 %v2759_v44, %v876_v54  ;;  %v1107_v8 = vmul.f32 %v2009_v41, %v2600_v5 }
 0x267   :  { %v2011_v60 = vpop.eup %2010  ;;  %v924_v53 = vmax.f32 %v882_v45, 0.0  ;;  %v1140_v12 = vadd.f32 %v2608_v6, %v1108_v61 }
 0x268   :  { %v2013_v48 = vpop.eup %2012  ;;  %v1048_v10 = vadd.f32 1.0, %v2011_v60  ;;  %v923_v52 = vmax.f32 %v877_v46, 0.0  ;;  %v1139_v51 = vadd.f32 %v2077_v1, %v1107_v8 }
 0x269   :  { %v1047_v49 = vadd.f32 1.0, %v2013_v48  ;;  %v956_v0 = vsub.f32 0.0, %v924_v53 }
 0x26a   :  { %2022 = vrcp.f32 %v1048_v10  ;;  %v955_v24 = vsub.f32 0.0, %v923_v52  ;;  %1675 = vmatprep.mubr.f32.mxu1 %v1139_v51 }
 0x26b   :  { %2024 = vrcp.f32 %v1047_v49  ;;  %v1017_v50 = vmul.f32 1.442695, %v956_v0  ;;  %1676 = vmatmul.mubr.f32.gmra.mrb[52].mxu1 %v1140_v12 }
 0x26c   :  { %v2015_v5 = vpop.eup %2014  ;;  %v1015_v59 = vmul.f32 1.442695, %v955_v24  ;;  %v1612_v13 = vpop.f32.mrb[30].mxu1 }
 0x26d   :  { %v2017_v11 = vpop.eup %2016  ;;  %2026 = vpow2.f32 %v1017_v50  ;;  %v892_v58 = vadd.f32 %v1612_v13, %v2759_v44  ;;  %v886_v14 = vpop.f32.mrb[31].mxu1  ;;  %v1110_v17 = vmul.f32 %v2015_v5, %v2633_v47 }
 0x26e   :  { %2028 = vpow2.f32 %v1015_v59  ;;  %v887_v18 = vadd.f32 %v2759_v44, %v886_v14  ;;  %v1109_v6 = vmul.f32 %v2017_v11, %v2622_v38 }
 0x26f   :  { %v2019_v21 = vpop.eup %2018  ;;  %v926_v22 = vmax.f32 %v892_v58, 0.0  ;;  %v1142_v56 = vadd.f32 %v2630_v9, %v1110_v17 }
 0x270   :  { %v2021_v26 = vpop.eup %2020  ;;  %v1050_v63 = vadd.f32 1.0, %v2019_v21  ;;  %v925_v57 = vmax.f32 %v887_v18, 0.0  ;;  %v1141_v28 = vadd.f32 %v2619_v37, %v1109_v6 }
 0x271   :  { %v1049_v62 = vadd.f32 1.0, %v2021_v26  ;;  %v958_v31 = vsub.f32 0.0, %v926_v22 }
 0x272   :  { %2030 = vrcp.f32 %v1050_v63  ;;  %v957_v4 = vsub.f32 0.0, %v925_v57  ;;  %1678 = vmatprep.mubr.f32.mxu1 %v1141_v28 }
 0x273   :  { %2032 = vrcp.f32 %v1049_v62  ;;  %v1021_v47 = vmul.f32 1.442695, %v958_v31  ;;  %1679 = vmatmul.mubr.f32.gmra.mrb[54].mxu1 %v1142_v56 }
 0x274   :  { %v2023_v44 = vpop.eup %2022  ;;  %v1019_v27 = vmul.f32 1.442695, %v957_v4 }
 0x275   :  { %v2025_v38 = vpop.eup %2024  ;;  %2034 = vpow2.f32 %v1021_v47  ;;  %v1112_v34 = vmul.f32 %v2023_v44, %v2663_v30 }
 0x276   :  { %2036 = vpow2.f32 %v1019_v27  ;;  %v1111_v2 = vmul.f32 %v2025_v38, %v2648_v20 }
 0x277   :  { %v2027_v37 = vpop.eup %2026  ;;  %v1144_v41 = vadd.f32 %v2660_v29, %v1112_v34 }
 0x278   :  { %v2029_v35 = vpop.eup %2028  ;;  %v1052_v36 = vadd.f32 1.0, %v2027_v37  ;;  %v1143_v9 = vadd.f32 %v2645_v19, %v1111_v2 }
 0x279   :  { %v1051_v55 = vadd.f32 1.0, %v2029_v35 }
 0x27a   :  { %2038 = vrcp.f32 %v1052_v36  ;;  %1681 = vmatprep.mubr.f32.mxu1 %v1143_v9 }
 0x27b   :  { %2040 = vrcp.f32 %v1051_v55  ;;  %1682 = vmatmul.mubr.f32.gmra.mrb[56].mxu1 %v1144_v41 }
 0x27c   :  { %v2031_v45 = vpop.eup %2030 }
 0x27d   :  { %v2033_v54 = vpop.eup %2032  ;;  %v1114_v61 = vmul.f32 %v2031_v45, %v2693_v7 }
 0x27e   :  { %v1113_v30 = vmul.f32 %v2033_v54, %v2678_v40 }
 0x27f   :  { %v2035_v46 = vpop.eup %2034  ;;  %v1146_v19 = vadd.f32 %v2690_v3, %v1114_v61 }
 0x280   :  { %v2037_v20 = vpop.eup %2036  ;;  %v1054_v8 = vadd.f32 1.0, %v2035_v46  ;;  %v1145_v60 = vadd.f32 %v2675_v39, %v1113_v30 }
 0x281   :  { %v1053_v53 = vadd.f32 1.0, %v2037_v20 }
 0x282   :  { %2042 = vrcp.f32 %v1054_v8  ;;  %1684 = vmatprep.mubr.f32.mxu1 %v1145_v60 }
 0x283   :  { %2044 = vrcp.f32 %v1053_v53  ;;  %1685 = vmatmul.mubr.f32.gmra.mrb[58].mxu1 %v1146_v19 }
 0x284   :  { %v2039_v29 = vpop.eup %2038 }
 0x285   :  { %v2041_v48 = vpop.eup %2040  ;;  %v1116_v10 = vmul.f32 %v2039_v29, %v2723_v25 }
 0x286   :  { %v1115_v7 = vmul.f32 %v2041_v48, %v2708_v16 }
 0x287   :  { %v1148_v52 = vadd.f32 %v2720_v23, %v1116_v10 }
 0x288   :  { %v1147_v40 = vadd.f32 %v2705_v15, %v1115_v7  ;;  %v2902_v15 = vld [vmem:[%s3038_s6] ss:$0 sm:$0xff] }
 0x28a   :  { %1687 = vmatprep.mubr.f32.mxu1 %v1147_v40 }
 0x28b   :  { %1688 = vmatmul.mubr.f32.gmra.mrb[60].mxu1 %v1148_v52 }
 0x28c   :  { %v2043_v39 = vpop.eup %2042 }
 0x28d   :  { %v2045_v1 = vpop.eup %2044  ;;  %v1118_v3 = vmul.f32 %v2043_v39, %v2753_v43 }
 0x28e   :  { %v1117_v51 = vmul.f32 %v2045_v1, %v2738_v33 }
 0x28f   :  { %v1150_v0 = vadd.f32 %v2750_v42, %v1118_v3 }
 0x290   :  { %v1149_v49 = vadd.f32 %v2735_v32, %v1117_v51 }
 0x292   :  { %1690 = vmatprep.mubr.f32.mxu1 %v1149_v49 }
 0x293   :  { %1691 = vmatmul.mubr.f32.gmra.mrb[62].mxu1 %v1150_v0 }
 0x2ee   :  { %v1647_v16 = vpop.f32.mrb[32].mxu1 }
 0x2ef   :  { %v1246_v23 = vadd.f32 %v1647_v16, %v2902_v15  ;;  %v1240_v25 = vpop.f32.mrb[33].mxu1 }
 0x2f0   :  { %v1241_v12 = vadd.f32 %v2902_v15, %v1240_v25 }
 0x2f1   :  { %1400 = vst [vmem:[%s3039_s7 + $0x8] sm:$0xff] %v1246_v23 }
 0x2f2   :  { %1399 = vst [vmem:[%s3039_s7] sm:$0xff] %v1241_v12 }
 0x2f6   :  { %v1650_v32 = vpop.f32.mrb[34].mxu1 }
 0x2f7   :  { %v1256_v33 = vadd.f32 %v1650_v32, %v2902_v15  ;;  %v1250_v42 = vpop.f32.mrb[35].mxu1 }
 0x2f8   :  { %v1251_v43 = vadd.f32 %v2902_v15, %v1250_v42 }
 0x2f9   :  { %1402 = vst [vmem:[%s3039_s7 + $0x18] sm:$0xff] %v1256_v33 }
 0x2fa   :  { %1401 = vst [vmem:[%s3039_s7 + $0x10] sm:$0xff] %v1251_v43 }
 0x2fe   :  { %v1653_v24 = vpop.f32.mrb[36].mxu1 }
 0x2ff   :  { %v1266_v50 = vadd.f32 %v1653_v24, %v2902_v15  ;;  %v1260_v5 = vpop.f32.mrb[37].mxu1 }
 0x300   :  { %v1261_v59 = vadd.f32 %v2902_v15, %v1260_v5 }
 0x301   :  { %1404 = vst [vmem:[%s3039_s7 + $0x28] sm:$0xff] %v1266_v50 }
 0x302   :  { %1403 = vst [vmem:[%s3039_s7 + $0x20] sm:$0xff] %v1261_v59 }
 0x306   :  { %v1656_v13 = vpop.f32.mrb[38].mxu1 }
 0x307   :  { %v1276_v11 = vadd.f32 %v1656_v13, %v2902_v15  ;;  %v1270_v58 = vpop.f32.mrb[39].mxu1 }
 0x308   :  { %v1271_v14 = vadd.f32 %v2902_v15, %v1270_v58 }
 0x309   :  { %1406 = vst [vmem:[%s3039_s7 + $0x38] sm:$0xff] %v1276_v11 }
 0x30a   :  { %1405 = vst [vmem:[%s3039_s7 + $0x30] sm:$0xff] %v1271_v14 }
 0x30e   :  { %v1659_v17 = vpop.f32.mrb[40].mxu1 }
 0x30f   :  { %v1286_v18 = vadd.f32 %v1659_v17, %v2902_v15  ;;  %v1280_v6 = vpop.f32.mrb[41].mxu1 }
 0x310   :  { %v1281_v21 = vadd.f32 %v2902_v15, %v1280_v6 }
 0x311   :  { %1408 = vst [vmem:[%s3039_s7 + $0x48] sm:$0xff] %v1286_v18 }
 0x312   :  { %1407 = vst [vmem:[%s3039_s7 + $0x40] sm:$0xff] %v1281_v21 }
 0x316   :  { %v1662_v22 = vpop.f32.mrb[42].mxu1 }
 0x317   :  { %v1296_v26 = vadd.f32 %v1662_v22, %v2902_v15  ;;  %v1290_v63 = vpop.f32.mrb[43].mxu1 }
 0x318   :  { %v1291_v57 = vadd.f32 %v2902_v15, %v1290_v63 }
 0x319   :  { %1410 = vst [vmem:[%s3039_s7 + $0x58] sm:$0xff] %v1296_v26 }
 0x31a   :  { %1409 = vst [vmem:[%s3039_s7 + $0x50] sm:$0xff] %v1291_v57 }
 0x31e   :  { %v1665_v28 = vpop.f32.mrb[44].mxu1 }
 0x31f   :  { %v1306_v62 = vadd.f32 %v1665_v28, %v2902_v15  ;;  %v1300_v31 = vpop.f32.mrb[45].mxu1 }
 0x320   :  { %v1301_v56 = vadd.f32 %v2902_v15, %v1300_v31 }
 0x321   :  { %1412 = vst [vmem:[%s3039_s7 + $0x68] sm:$0xff] %v1306_v62 }
 0x322   :  { %1411 = vst [vmem:[%s3039_s7 + $0x60] sm:$0xff] %v1301_v56 }
 0x326   :  { %v1668_v4 = vpop.f32.mrb[46].mxu1 }
 0x327   :  { %v1316_v47 = vadd.f32 %v1668_v4, %v2902_v15  ;;  %v1310_v44 = vpop.f32.mrb[47].mxu1 }
 0x328   :  { %v1311_v27 = vadd.f32 %v2902_v15, %v1310_v44 }
 0x329   :  { %1414 = vst [vmem:[%s3039_s7 + $0x78] sm:$0xff] %v1316_v47 }
 0x32a   :  { %1413 = vst [vmem:[%s3039_s7 + $0x70] sm:$0xff] %v1311_v27 }
 0x32e   :  { %v1671_v38 = vpop.f32.mrb[48].mxu1 }
 0x32f   :  { %v1326_v34 = vadd.f32 %v1671_v38, %v2902_v15  ;;  %v1320_v2 = vpop.f32.mrb[49].mxu1 }
 0x330   :  { %v1321_v37 = vadd.f32 %v2902_v15, %v1320_v2 }
 0x331   :  { %1416 = vst [vmem:[%s3039_s7 + $0x88] sm:$0xff] %v1326_v34 }
 0x332   :  { %1415 = vst [vmem:[%s3039_s7 + $0x80] sm:$0xff] %v1321_v37 }
 0x336   :  { %v1674_v35 = vpop.f32.mrb[50].mxu1 }
 0x337   :  { %v1336_v36 = vadd.f32 %v1674_v35, %v2902_v15  ;;  %v1330_v9 = vpop.f32.mrb[51].mxu1 }
 0x338   :  { %v1331_v55 = vadd.f32 %v2902_v15, %v1330_v9 }
 0x339   :  { %1418 = vst [vmem:[%s3039_s7 + $0x98] sm:$0xff] %v1336_v36 }
 0x33a   :  { %1417 = vst [vmem:[%s3039_s7 + $0x90] sm:$0xff] %v1331_v55 }
 0x33e   :  { %v1677_v41 = vpop.f32.mrb[52].mxu1 }
 0x33f   :  { %v1346_v45 = vadd.f32 %v1677_v41, %v2902_v15  ;;  %v1340_v54 = vpop.f32.mrb[53].mxu1 }
 0x340   :  { %v1341_v61 = vadd.f32 %v2902_v15, %v1340_v54 }
 0x341   :  { %1420 = vst [vmem:[%s3039_s7 + $0xa8] sm:$0xff] %v1346_v45 }
 0x342   :  { %1419 = vst [vmem:[%s3039_s7 + $0xa0] sm:$0xff] %v1341_v61 }
 0x346   :  { %v1680_v30 = vpop.f32.mrb[54].mxu1 }
 0x347   :  { %v1356_v46 = vadd.f32 %v1680_v30, %v2902_v15  ;;  %v1350_v20 = vpop.f32.mrb[55].mxu1 }
 0x348   :  { %v1351_v8 = vadd.f32 %v2902_v15, %v1350_v20 }
 0x349   :  { %1422 = vst [vmem:[%s3039_s7 + $0xb8] sm:$0xff] %v1356_v46 }
 0x34a   :  { %1421 = vst [vmem:[%s3039_s7 + $0xb0] sm:$0xff] %v1351_v8 }
 0x34e   :  { %v1683_v60 = vpop.f32.mrb[56].mxu1 }
 0x34f   :  { %v1366_v53 = vadd.f32 %v1683_v60, %v2902_v15  ;;  %v1360_v19 = vpop.f32.mrb[57].mxu1 }
 0x350   :  { %v1361_v29 = vadd.f32 %v2902_v15, %v1360_v19 }
 0x351   :  { %1424 = vst [vmem:[%s3039_s7 + $0xc8] sm:$0xff] %v1366_v53 }
 0x352   :  { %1423 = vst [vmem:[%s3039_s7 + $0xc0] sm:$0xff] %v1361_v29 }
 0x356   :  { %v1686_v48 = vpop.f32.mrb[58].mxu1 }
 0x357   :  { %v1376_v10 = vadd.f32 %v1686_v48, %v2902_v15  ;;  %v1370_v7 = vpop.f32.mrb[59].mxu1 }
 0x358   :  { %v1371_v40 = vadd.f32 %v2902_v15, %v1370_v7 }
 0x359   :  { %1426 = vst [vmem:[%s3039_s7 + $0xd8] sm:$0xff] %v1376_v10 }
 0x35a   :  { %1425 = vst [vmem:[%s3039_s7 + $0xd0] sm:$0xff] %v1371_v40 }
 0x35e   :  { %v1689_v52 = vpop.f32.mrb[60].mxu1 }
 0x35f   :  { %v1386_v39 = vadd.f32 %v1689_v52, %v2902_v15  ;;  %v1380_v1 = vpop.f32.mrb[61].mxu1 }
 0x360   :  { %v1381_v3 = vadd.f32 %v2902_v15, %v1380_v1 }
 0x361   :  { %1428 = vst [vmem:[%s3039_s7 + $0xe8] sm:$0xff] %v1386_v39 }
 0x362   :  { %1427 = vst [vmem:[%s3039_s7 + $0xe0] sm:$0xff] %v1381_v3 }
 0x366   :  { %v1692_v51 = vpop.f32.mrb[62].mxu1 }
 0x367   :  { %v1396_v49 = vadd.f32 %v1692_v51, %v2902_v15  ;;  %v1390_v0 = vpop.f32.mrb[63].mxu1 }
 0x368   :  { %v1391_v16 = vadd.f32 %v2902_v15, %v1390_v0 }
 0x369   :  { %1430 = vst [vmem:[%s3039_s7 + $0xf8] sm:$0xff] %v1396_v49 }
 0x36a   :  { %1429 = vst [vmem:[%s3039_s7 + $0xf0] sm:$0xff] %v1391_v16 }

</bundles_post_ra>
